<compile_context>
chip_gen: v7x
topology: tpu7x:2x2x1
jax: 0.10.0
libtpu: 0.0.40
codegen_flags: <defaults>
</compile_context>

<pallas_src>
import jax
import jax.numpy as jnp
from jax import lax
from jax.experimental import pallas as pl
from jax.experimental.pallas import tpu as pltpu


def _vmem_limit_bytes():
    """~3/4 of physical VMEM: headroom on v7x (64 MiB), above default scoped on v5e/v6e."""
    try:
        return int(pltpu.get_tpu_info().vmem_capacity_bytes * 3 // 4)
    except Exception:
        return 48 * 1024 * 1024


# -----------------------------------------------------------------------------
# Core kernel: encoder LSTM + decoder LSTM (serial recurrences)
# -----------------------------------------------------------------------------
def seq2seq_core_kernel(emb_ref, wih_e_ref, whh_e_ref, b_e_ref,
                        wih_d_ref, whh_d_ref, b_d_ref,
                        dec_ref,
                        seq_buf, xw_buf):
    seq = emb_ref.shape[0]
    H_e = whh_e_ref.shape[0]
    H_d = whh_d_ref.shape[0]
    bf16 = jnp.bfloat16

    def lstm(wih_ref, whh_ref, b_ref, x_bf16, H):
        # Precompute x @ W_ih^T + (b_ih + b_hh) for all timesteps (bf16 MXU, f32 acc).
        xw_buf[:, pl.ds(0, 4 * H)] = jnp.dot(
            x_bf16, wih_ref[...], preferred_element_type=jnp.float32) + b_ref[...]

        # Hoisted once per recurrence: scale only the g-gate slice by 2 so a single
        # sigmoid EUP push covers all four gates; tanh(g) = 2*sigmoid(2g) - 1.
        col = lax.broadcasted_iota(jnp.int32, (1, 4 * H), 1)
        g_scale = jnp.where((col >= 2 * H) & (col < 3 * H),
                            jnp.float32(2.0), jnp.float32(1.0))

        # TODO(synk): W_hh is loop-invariant; explicit pltpu.matmul_push_rhs /
        # matmul_acc_lhs could pin it in the MXU across the recurrence — we rely on
        # Mosaic hoisting the per-step weight push instead.
        def step(t, carry):
            h, c = carry  # (1, H) f32 values carried in vregs — no VMEM round trip
            gates = xw_buf[pl.ds(t, 1), pl.ds(0, 4 * H)] + jnp.dot(
                h.astype(bf16), whh_ref[...], preferred_element_type=jnp.float32)
            sg = jax.nn.sigmoid(gates * g_scale)       # single EUP push for all gates
            i = sg[:, 0:H]
            f = sg[:, H:2 * H]
            g = 2.0 * sg[:, 2 * H:3 * H] - 1.0         # == tanh(g), VPU fix-up
            o = sg[:, 3 * H:4 * H]
            c_new = f * c + i * g
            h_new = o * jnp.tanh(c_new)                # unavoidable second EUP push
            seq_buf[pl.ds(t, 1), pl.ds(0, H)] = h_new
            return (h_new, c_new)

        h0 = jnp.zeros((1, H), jnp.float32)
        lax.fori_loop(0, seq, step, (h0, h0), unroll=8)

    # Encoder over the (already gathered) embeddings.
    lstm(wih_e_ref, whh_e_ref, b_e_ref, emb_ref[...], H_e)
    # Decoder consumes the encoder hidden rows; xw_buf / seq_buf are reused.
    lstm(wih_d_ref, whh_d_ref, b_d_ref, seq_buf[:, pl.ds(0, H_e)].astype(bf16), H_d)
    # Single static full-tile store of the decoder sequence, cast to bf16.
    dec_ref[...] = seq_buf[:, pl.ds(0, H_d)].astype(dec_ref.dtype)


# -----------------------------------------------------------------------------
# Head kernel: Linear + LogSoftmax(dim=1), gridded (parallel) over sequence tiles
# -----------------------------------------------------------------------------
def head_kernel(dec_ref, wlin_ref, blin_ref, out_ref):
    logits = jnp.dot(dec_ref[...], wlin_ref[...],
                     preferred_element_type=jnp.float32) + blin_ref[...]
    m = jnp.max(logits, axis=1, keepdims=True)
    z = logits - m
    lse = jnp.log(jnp.sum(jnp.exp(z), axis=1, keepdims=True))
    out_ref[...] = z - lse


def seq2seq_forward(x, params):
    """x: (seq_len,) int token ids. Returns (seq_len, vocab_dec) f32 log-probs."""
    (emb_tbl,
     wih_e_t, whh_e_t, b_e,
     wih_d_t, whh_d_t, b_d,
     wlin_t, blin) = params

    seq = x.shape[0]
    emb_dim = emb_tbl.shape[1]
    H_e = whh_e_t.shape[0]
    H_d = whh_d_t.shape[0]
    vocab_dec = wlin_t.shape[1]
    H_max = max(H_e, H_d)
    vmem_limit = _vmem_limit_bytes()

    # Embedding row gather in XLA: only the seq rows actually used reach the kernel.
    emb = emb_tbl[x.astype(jnp.int32)].astype(jnp.bfloat16)

    vmem = pl.BlockSpec(memory_space=pltpu.MemorySpace.VMEM)

    cost_core = pl.CostEstimate(
        flops=int(2 * seq * (emb_dim * 4 * H_e + H_e * 4 * H_e
                             + H_e * 4 * H_d + H_d * 4 * H_d)),
        transcendentals=int(seq * (5 * H_e + 5 * H_d)),
        bytes_accessed=int(2 * seq * emb_dim
                           + 2 * (wih_e_t.size + whh_e_t.size + wih_d_t.size + whh_d_t.size)
                           + 4 * (b_e.size + b_d.size) + 2 * seq * H_d),
    )

    dec_out = pl.pallas_call(
        seq2seq_core_kernel,
        out_shape=jax.ShapeDtypeStruct((seq, H_d), jnp.bfloat16),
        in_specs=[vmem] * 7,
        out_specs=vmem,
        scratch_shapes=[
            pltpu.VMEM((seq, H_max), jnp.float32),      # enc then dec hidden rows (reused)
            pltpu.VMEM((seq, 4 * H_max), jnp.float32),  # xw precompute, reused enc -> dec
        ],
        compiler_params=pltpu.CompilerParams(vmem_limit_bytes=vmem_limit),
        cost_estimate=cost_core,
    )(emb, wih_e_t, whh_e_t, b_e, wih_d_t, whh_d_t, b_d)

    # TODO(synk): on v7x the head could overlap the decoder on the second TensorCore
    # (decoder rows are final per timestep); kept as a separate call for simplicity.

    # --- Head: lane-dense output (vocab padded to a multiple of 128; padded columns get
    # a -1e30 bias so they contribute ~0 to the softmax sum), sliced back afterwards. ---
    vocab_pad = ((vocab_dec + 127) // 128) * 128
    if vocab_pad != vocab_dec:
        wlin_p = jnp.pad(wlin_t, ((0, 0), (0, vocab_pad - vocab_dec)))
        blin_p = jnp.pad(blin, ((0, 0), (0, vocab_pad - vocab_dec)),
                         constant_values=-1e30)
    else:
        wlin_p, blin_p = wlin_t, blin

    tile_s = min(256, seq) if seq % 8 == 0 else seq
    grid = (pl.cdiv(seq, tile_s),)

    cost_head = pl.CostEstimate(
        flops=int(2 * seq * H_d * vocab_pad),
        transcendentals=int(seq * vocab_pad + seq),
        bytes_accessed=int(2 * seq * H_d + 2 * wlin_p.size + 4 * blin_p.size
                           + 4 * seq * vocab_pad),
    )

    out_pad = pl.pallas_call(
        head_kernel,
        out_shape=jax.ShapeDtypeStruct((seq, vocab_pad), jnp.float32),
        grid=grid,
        in_specs=[pl.BlockSpec((tile_s, H_d), lambda i: (i, 0)),
                  pl.BlockSpec((H_d, vocab_pad), lambda i: (0, 0)),
                  pl.BlockSpec((1, vocab_pad), lambda i: (0, 0))],
        out_specs=pl.BlockSpec((tile_s, vocab_pad), lambda i: (i, 0)),
        compiler_params=pltpu.CompilerParams(
            dimension_semantics=("parallel",),
            vmem_limit_bytes=vmem_limit),
        cost_estimate=cost_head,
    )(dec_out, wlin_p, blin_p)

    return out_pad[:, :vocab_dec]


def init_params(key, vocab_enc, hidden_enc, vocab_dec, hidden_dec, emb_dim):
    """Deterministic PyTorch-style init. Matmul weights pre-transposed, stored in bf16."""
    ks = jax.random.split(key, 12)
    bf16 = jnp.bfloat16

    def unif(k, shape, scale):
        return jax.random.uniform(k, shape, jnp.float32, -scale, scale)

    emb_tbl = jax.random.normal(ks[0], (vocab_enc, emb_dim), jnp.float32)   # nn.Embedding ~ N(0,1)

    k_e = 1.0 / jnp.sqrt(hidden_enc)
    wih_e = unif(ks[1], (4 * hidden_enc, emb_dim), k_e)
    whh_e = unif(ks[2], (4 * hidden_enc, hidden_enc), k_e)
    b_e = unif(ks[3], (4 * hidden_enc,), k_e) + unif(ks[4], (4 * hidden_enc,), k_e)

    k_d = 1.0 / jnp.sqrt(hidden_dec)
    wih_d = unif(ks[5], (4 * hidden_dec, hidden_enc), k_d)
    whh_d = unif(ks[6], (4 * hidden_dec, hidden_dec), k_d)
    b_d = unif(ks[7], (4 * hidden_dec,), k_d) + unif(ks[8], (4 * hidden_dec,), k_d)

    k_l = 1.0 / jnp.sqrt(hidden_dec)
    wlin = unif(ks[9], (vocab_dec, hidden_dec), k_l)
    blin = unif(ks[10], (vocab_dec,), k_l)

    return (emb_tbl.astype(bf16),                       # rows only ever feed the MXU as bf16
            wih_e.T.astype(bf16), whh_e.T.astype(bf16), b_e.reshape(1, -1),
            wih_d.T.astype(bf16), whh_d.T.astype(bf16), b_d.reshape(1, -1),
            wlin.T.astype(bf16), blin.reshape(1, -1))


def seq2seq_ref(x, params):
    """Pure-JAX reference with identical semantics (bf16 MXU operands, f32 accumulation)."""
    (emb_tbl, wih_e_t, whh_e_t, b_e, wih_d_t, whh_d_t, b_d, wlin_t, blin) = params
    bf16 = jnp.bfloat16

    def dot_bf16(a, b):
        return jnp.dot(a.astype(bf16), b.astype(bf16), preferred_element_type=jnp.float32)

    def run_lstm(seq_in, wih_t, whh_t, b, H):
        xw = dot_bf16(seq_in, wih_t) + b

        def step(carry, xw_t):
            h, c = carry
            gates = xw_t + dot_bf16(h[None, :], whh_t)[0]
            i = jax.nn.sigmoid(gates[0:H])
            f = jax.nn.sigmoid(gates[H:2 * H])
            g = jnp.tanh(gates[2 * H:3 * H])
            o = jax.nn.sigmoid(gates[3 * H:4 * H])
            c = f * c + i * g
            h = o * jnp.tanh(c)
            return (h, c), h

        h0 = jnp.zeros((H,), jnp.float32)
        (_, _), outs = lax.scan(step, (h0, h0), xw)
        return outs

    emb = emb_tbl[x].astype(jnp.float32)
    enc = run_lstm(emb, wih_e_t, whh_e_t, b_e[0], whh_e_t.shape[0])
    dec = run_lstm(enc, wih_d_t, whh_d_t, b_d[0], whh_d_t.shape[0])
    logits = dot_bf16(dec, wlin_t) + blin
    return jax.nn.log_softmax(logits, axis=1)


if __name__ == "__main__":
    vocab_size_enc, hidden_size_enc = 16, 32
    vocab_size_dec, hidden_size_dec = 16, 32
    batch_size = 4          # ctor arg; the module uses it as embedding dim / encoder LSTM input size
    seq_len = 8

    key = jax.random.PRNGKey(0)
    k_param, k_x = jax.random.split(key)
    params = init_params(k_param, vocab_size_enc, hidden_size_enc,
                         vocab_size_dec, hidden_size_dec, batch_size)
    x = jax.random.randint(k_x, (seq_len,), 0, vocab_size_enc, dtype=jnp.int32)

    fwd = jax.jit(seq2seq_forward)
    out = jax.block_until_ready(fwd(x, params))

    ref = jax.block_until_ready(seq2seq_ref(x, params))
    assert out.shape == (seq_len, vocab_size_dec)
    assert jnp.max(jnp.abs(out - ref)) < 5e-3, "mismatch vs pure-JAX reference"

    print("KERNEL_OK")
</pallas_src>

<mosaic_0001>
module attributes {stable_mosaic.version = 11 : i64} {
  func.func @head_kernel(%arg0: i32, %arg1: memref<8x32xbf16, #tpu.memory_space<vmem>>, %arg2: memref<32x128xbf16, #tpu.memory_space<vmem>>, %arg3: memref<1x128xf32, #tpu.memory_space<vmem>>, %arg4: memref<8x128xf32, #tpu.memory_space<vmem>>) attributes {dimension_semantics = [#tpu.dimension_semantics<parallel>], iteration_bounds = array<i64: 1>, scalar_prefetch = 0 : i64, scratch_operands = 0 : i64, tpu.core_type = #tpu.core_type<tc>, window_params = [{transform_indices = @transform_0, window_bounds = array<i64: 8, 32>}, {pipeline_mode = #tpu.pipeline_mode<synchronous>, transform_indices = @transform_1, window_bounds = array<i64: 32, 128>}, {pipeline_mode = #tpu.pipeline_mode<synchronous>, transform_indices = @transform_2, window_bounds = array<i64: 1, 128>}, {transform_indices = @transform_3, window_bounds = array<i64: 8, 128>}]} {
    %c0 = arith.constant 0 : index
    %c0_0 = arith.constant 0 : index
    %0 = vector.load %arg1[%c0, %c0_0] : memref<8x32xbf16, #tpu.memory_space<vmem>>, vector<8x32xbf16>
    %c0_1 = arith.constant 0 : index
    %c0_2 = arith.constant 0 : index
    %1 = vector.load %arg2[%c0_1, %c0_2] : memref<32x128xbf16, #tpu.memory_space<vmem>>, vector<32x128xbf16>
    %cst = arith.constant dense<0.000000e+00> : vector<8x128xf32>
    %2 = tpu.matmul %0, %1, %cst {dimension_numbers = #tpu.dot_dimension_numbers<[1], [0], [0], [1], [0, 0, 1, 1], [], []>} : vector<8x32xbf16>, vector<32x128xbf16>, vector<8x128xf32> -> vector<8x128xf32>
    %c0_3 = arith.constant 0 : index
    %c0_4 = arith.constant 0 : index
    %3 = vector.load %arg3[%c0_3, %c0_4] : memref<1x128xf32, #tpu.memory_space<vmem>>, vector<1x128xf32>
    %4 = vector.broadcast %3 : vector<1x128xf32> to vector<8x128xf32>
    %5 = arith.addf %2, %4 : vector<8x128xf32>
    %cst_5 = arith.constant dense<0xFF800000> : vector<8xf32>
    %6 = vector.multi_reduction <maximumf>, %5, %cst_5 [1] : vector<8x128xf32> to vector<8xf32>
    %7 = vector.shape_cast %6 : vector<8xf32> to vector<8x1xf32>
    %8 = vector.broadcast %7 : vector<8x1xf32> to vector<8x128xf32>
    %9 = arith.subf %5, %8 : vector<8x128xf32>
    %10 = math.exp %9 : vector<8x128xf32>
    %cst_6 = arith.constant dense<0.000000e+00> : vector<8xf32>
    %11 = vector.multi_reduction <add>, %10, %cst_6 [1] : vector<8x128xf32> to vector<8xf32>
    %12 = vector.shape_cast %11 : vector<8xf32> to vector<8x1xf32>
    %13 = math.log %12 : vector<8x1xf32>
    %14 = vector.broadcast %13 : vector<8x1xf32> to vector<8x128xf32>
    %15 = arith.subf %9, %14 : vector<8x128xf32>
    %c0_7 = arith.constant 0 : index
    %c0_8 = arith.constant 0 : index
    %16 = vector.load %arg4[%c0_7, %c0_8] : memref<8x128xf32, #tpu.memory_space<vmem>>, vector<8x128xf32>
    tpu.vector_store %arg4[%c0_7, %c0_8], %15 {strides = array<i32>} : memref<8x128xf32, #tpu.memory_space<vmem>>, vector<8x128xf32>,
    return
  }
  func.func @transform_0(%arg0: i32) -> (i32, i32) {
    %c0_i32 = arith.constant 0 : i32
    %c0_i32_0 = arith.constant 0 : i32
    return %arg0, %c0_i32 : i32, i32
  }
  func.func @transform_1(%arg0: i32) -> (i32, i32) {
    %c0_i32 = arith.constant 0 : i32
    %c0_i32_0 = arith.constant 0 : i32
    %c0_i32_1 = arith.constant 0 : i32
    return %c0_i32, %c0_i32_0 : i32, i32
  }
  func.func @transform_2(%arg0: i32) -> (i32, i32) {
    %c0_i32 = arith.constant 0 : i32
    %c0_i32_0 = arith.constant 0 : i32
    %c0_i32_1 = arith.constant 0 : i32
    return %c0_i32, %c0_i32_0 : i32, i32
  }
  func.func @transform_3(%arg0: i32) -> (i32, i32) {
    %c0_i32 = arith.constant 0 : i32
    %c0_i32_0 = arith.constant 0 : i32
    return %arg0, %c0_i32 : i32, i32
  }
}

module attributes {stable_mosaic.version = 11 : i64} {
  func.func @seq2seq_core_kernel(%arg0: memref<8x4xbf16, #tpu.memory_space<vmem>>, %arg1: memref<4x128xbf16, #tpu.memory_space<vmem>>, %arg2: memref<32x128xbf16, #tpu.memory_space<vmem>>, %arg3: memref<1x128xf32, #tpu.memory_space<vmem>>, %arg4: memref<32x128xbf16, #tpu.memory_space<vmem>>, %arg5: memref<32x128xbf16, #tpu.memory_space<vmem>>, %arg6: memref<1x128xf32, #tpu.memory_space<vmem>>, %arg7: memref<8x32xbf16, #tpu.memory_space<vmem>>, %arg8: memref<8x32xf32, #tpu.memory_space<vmem>>, %arg9: memref<8x128xf32, #tpu.memory_space<vmem>>) attributes {dimension_semantics = [], scalar_prefetch = 0 : i64, scratch_operands = 2 : i64, tpu.core_type = #tpu.core_type<tc>} {
    %c0 = arith.constant 0 : index
    %c0_0 = arith.constant 0 : index
    %0 = vector.load %arg0[%c0, %c0_0] : memref<8x4xbf16, #tpu.memory_space<vmem>>, vector<8x4xbf16>
    %c0_1 = arith.constant 0 : index
    %c0_2 = arith.constant 0 : index
    %1 = vector.load %arg1[%c0_1, %c0_2] : memref<4x128xbf16, #tpu.memory_space<vmem>>, vector<4x128xbf16>
    %cst = arith.constant dense<0.000000e+00> : vector<8x128xf32>
    %2 = tpu.matmul %0, %1, %cst {dimension_numbers = #tpu.dot_dimension_numbers<[1], [0], [0], [1], [0, 0, 1, 1], [], []>} : vector<8x4xbf16>, vector<4x128xbf16>, vector<8x128xf32> -> vector<8x128xf32>
    %c0_3 = arith.constant 0 : index
    %c0_4 = arith.constant 0 : index
    %3 = vector.load %arg3[%c0_3, %c0_4] : memref<1x128xf32, #tpu.memory_space<vmem>>, vector<1x128xf32>
    %4 = vector.broadcast %3 : vector<1x128xf32> to vector<8x128xf32>
    %5 = arith.addf %2, %4 : vector<8x128xf32>
    %c0_5 = arith.constant 0 : index
    %c0_6 = arith.constant 0 : index
    %6 = vector.load %arg9[%c0_5, %c0_6] : memref<8x128xf32, #tpu.memory_space<vmem>>, vector<8x128xf32>
    tpu.vector_store %arg9[%c0_5, %c0_6], %5 {strides = array<i32>} : memref<8x128xf32, #tpu.memory_space<vmem>>, vector<8x128xf32>,
    %7 = tpu.iota {dimensions = array<i32: 1>} : vector<1x128xi32>
    %c64_i32 = arith.constant 64 : i32
    %8 = vector.broadcast %c64_i32 : i32 to vector<1x128xi32>
    %9 = arith.cmpi sge, %7, %8 : vector<1x128xi32>
    %c96_i32 = arith.constant 96 : i32
    %10 = vector.broadcast %c96_i32 : i32 to vector<1x128xi32>
    %11 = arith.cmpi slt, %7, %10 : vector<1x128xi32>
    %12 = arith.andi %9, %11 : vector<1x128xi1>
    %cst_7 = arith.constant 2.000000e+00 : f32
    %cst_8 = arith.constant 1.000000e+00 : f32
    %13 = vector.broadcast %cst_7 : f32 to vector<1x128xf32>
    %14 = vector.broadcast %cst_8 : f32 to vector<1x128xf32>
    %15 = arith.select %12, %13, %14 : vector<1x128xi1>, vector<1x128xf32>
    %cst_9 = arith.constant 0.000000e+00 : f32
    %16 = vector.broadcast %cst_9 : f32 to vector<1x32xf32>
    %c0_i32 = arith.constant 0 : i32
    %17 = arith.index_cast %c0_i32 : i32 to index
    %c0_10 = arith.constant 0 : index
    %18 = vector.load %arg9[%17, %c0_10] : memref<8x128xf32, #tpu.memory_space<vmem>>, vector<1x128xf32>
    %19 = arith.truncf %16 : vector<1x32xf32> to vector<1x32xbf16>
    %c0_11 = arith.constant 0 : index
    %c0_12 = arith.constant 0 : index
    %20 = vector.load %arg2[%c0_11, %c0_12] : memref<32x128xbf16, #tpu.memory_space<vmem>>, vector<32x128xbf16>
    %cst_13 = arith.constant dense<0.000000e+00> : vector<1x128xf32>
    %21 = tpu.matmul %19, %20, %cst_13 {dimension_numbers = #tpu.dot_dimension_numbers<[1], [0], [0], [1], [0, 0, 1, 1], [], []>} : vector<1x32xbf16>, vector<32x128xbf16>, vector<1x128xf32> -> vector<1x128xf32>
    %22 = arith.addf %18, %21 : vector<1x128xf32>
    %23 = arith.mulf %22, %15 : vector<1x128xf32>
    %24 = arith.negf %23 : vector<1x128xf32>
    %25 = math.exp %24 : vector<1x128xf32>
    %cst_14 = arith.constant 1.000000e+00 : f32
    %26 = vector.broadcast %cst_14 : f32 to vector<1x128xf32>
    %27 = arith.addf %26, %25 : vector<1x128xf32>
    %28 = arith.divf %26, %27 : vector<1x128xf32>
    %29 = vector.extract_strided_slice %28 {offsets = [0, 0], sizes = [1, 32], strides = [1, 1]} : vector<1x128xf32> to vector<1x32xf32>
    %30 = vector.extract_strided_slice %28 {offsets = [0, 32], sizes = [1, 32], strides = [1, 1]} : vector<1x128xf32> to vector<1x32xf32>
    %31 = vector.extract_strided_slice %28 {offsets = [0, 64], sizes = [1, 32], strides = [1, 1]} : vector<1x128xf32> to vector<1x32xf32>
    %cst_15 = arith.constant 2.000000e+00 : f32
    %32 = vector.broadcast %cst_15 : f32 to vector<1x32xf32>
    %33 = arith.mulf %32, %31 : vector<1x32xf32>
    %cst_16 = arith.constant 1.000000e+00 : f32
    %34 = vector.broadcast %cst_16 : f32 to vector<1x32xf32>
    %35 = arith.subf %33, %34 : vector<1x32xf32>
    %36 = vector.extract_strided_slice %28 {offsets = [0, 96], sizes = [1, 32], strides = [1, 1]} : vector<1x128xf32> to vector<1x32xf32>
    %37 = arith.mulf %30, %16 : vector<1x32xf32>
    %38 = arith.mulf %29, %35 : vector<1x32xf32>
    %39 = arith.addf %37, %38 : vector<1x32xf32>
    %40 = math.tanh %39 : vector<1x32xf32>
    %41 = arith.mulf %36, %40 : vector<1x32xf32>
    %42 = arith.index_cast %c0_i32 : i32 to index
    %c0_17 = arith.constant 0 : index
    %43 = vector.load %arg8[%42, %c0_17] : memref<8x32xf32, #tpu.memory_space<vmem>>, vector<1x32xf32>
    tpu.vector_store %arg8[%42, %c0_17], %41 {strides = array<i32>} : memref<8x32xf32, #tpu.memory_space<vmem>>, vector<1x32xf32>,
    %c1_i32 = arith.constant 1 : i32
    %44 = arith.index_cast %c1_i32 : i32 to index
    %c0_18 = arith.constant 0 : index
    %45 = vector.load %arg9[%44, %c0_18] : memref<8x128xf32, #tpu.memory_space<vmem>>, vector<1x128xf32>
    %46 = arith.truncf %41 : vector<1x32xf32> to vector<1x32xbf16>
    %c0_19 = arith.constant 0 : index
    %c0_20 = arith.constant 0 : index
    %47 = vector.load %arg2[%c0_19, %c0_20] : memref<32x128xbf16, #tpu.memory_space<vmem>>, vector<32x128xbf16>
    %cst_21 = arith.constant dense<0.000000e+00> : vector<1x128xf32>
    %48 = tpu.matmul %46, %47, %cst_21 {dimension_numbers = #tpu.dot_dimension_numbers<[1], [0], [0], [1], [0, 0, 1, 1], [], []>} : vector<1x32xbf16>, vector<32x128xbf16>, vector<1x128xf32> -> vector<1x128xf32>
    %49 = arith.addf %45, %48 : vector<1x128xf32>
    %50 = arith.mulf %49, %15 : vector<1x128xf32>
    %51 = arith.negf %50 : vector<1x128xf32>
    %52 = math.exp %51 : vector<1x128xf32>
    %cst_22 = arith.constant 1.000000e+00 : f32
    %53 = vector.broadcast %cst_22 : f32 to vector<1x128xf32>
    %54 = arith.addf %53, %52 : vector<1x128xf32>
    %55 = arith.divf %53, %54 : vector<1x128xf32>
    %56 = vector.extract_strided_slice %55 {offsets = [0, 0], sizes = [1, 32], strides = [1, 1]} : vector<1x128xf32> to vector<1x32xf32>
    %57 = vector.extract_strided_slice %55 {offsets = [0, 32], sizes = [1, 32], strides = [1, 1]} : vector<1x128xf32> to vector<1x32xf32>
    %58 = vector.extract_strided_slice %55 {offsets = [0, 64], sizes = [1, 32], strides = [1, 1]} : vector<1x128xf32> to vector<1x32xf32>
    %cst_23 = arith.constant 2.000000e+00 : f32
    %59 = vector.broadcast %cst_23 : f32 to vector<1x32xf32>
    %60 = arith.mulf %59, %58 : vector<1x32xf32>
    %cst_24 = arith.constant 1.000000e+00 : f32
    %61 = vector.broadcast %cst_24 : f32 to vector<1x32xf32>
    %62 = arith.subf %60, %61 : vector<1x32xf32>
    %63 = vector.extract_strided_slice %55 {offsets = [0, 96], sizes = [1, 32], strides = [1, 1]} : vector<1x128xf32> to vector<1x32xf32>
    %64 = arith.mulf %57, %39 : vector<1x32xf32>
    %65 = arith.mulf %56, %62 : vector<1x32xf32>
    %66 = arith.addf %64, %65 : vector<1x32xf32>
    %67 = math.tanh %66 : vector<1x32xf32>
    %68 = arith.mulf %63, %67 : vector<1x32xf32>
    %69 = arith.index_cast %c1_i32 : i32 to index
    %c0_25 = arith.constant 0 : index
    %70 = vector.load %arg8[%69, %c0_25] : memref<8x32xf32, #tpu.memory_space<vmem>>, vector<1x32xf32>
    tpu.vector_store %arg8[%69, %c0_25], %68 {strides = array<i32>} : memref<8x32xf32, #tpu.memory_space<vmem>>, vector<1x32xf32>,
    %c2_i32 = arith.constant 2 : i32
    %71 = arith.index_cast %c2_i32 : i32 to index
    %c0_26 = arith.constant 0 : index
    %72 = vector.load %arg9[%71, %c0_26] : memref<8x128xf32, #tpu.memory_space<vmem>>, vector<1x128xf32>
    %73 = arith.truncf %68 : vector<1x32xf32> to vector<1x32xbf16>
    %c0_27 = arith.constant 0 : index
    %c0_28 = arith.constant 0 : index
    %74 = vector.load %arg2[%c0_27, %c0_28] : memref<32x128xbf16, #tpu.memory_space<vmem>>, vector<32x128xbf16>
    %cst_29 = arith.constant dense<0.000000e+00> : vector<1x128xf32>
    %75 = tpu.matmul %73, %74, %cst_29 {dimension_numbers = #tpu.dot_dimension_numbers<[1], [0], [0], [1], [0, 0, 1, 1], [], []>} : vector<1x32xbf16>, vector<32x128xbf16>, vector<1x128xf32> -> vector<1x128xf32>
    %76 = arith.addf %72, %75 : vector<1x128xf32>
    %77 = arith.mulf %76, %15 : vector<1x128xf32>
    %78 = arith.negf %77 : vector<1x128xf32>
    %79 = math.exp %78 : vector<1x128xf32>
    %cst_30 = arith.constant 1.000000e+00 : f32
    %80 = vector.broadcast %cst_30 : f32 to vector<1x128xf32>
    %81 = arith.addf %80, %79 : vector<1x128xf32>
    %82 = arith.divf %80, %81 : vector<1x128xf32>
    %83 = vector.extract_strided_slice %82 {offsets = [0, 0], sizes = [1, 32], strides = [1, 1]} : vector<1x128xf32> to vector<1x32xf32>
    %84 = vector.extract_strided_slice %82 {offsets = [0, 32], sizes = [1, 32], strides = [1, 1]} : vector<1x128xf32> to vector<1x32xf32>
    %85 = vector.extract_strided_slice %82 {offsets = [0, 64], sizes = [1, 32], strides = [1, 1]} : vector<1x128xf32> to vector<1x32xf32>
    %cst_31 = arith.constant 2.000000e+00 : f32
    %86 = vector.broadcast %cst_31 : f32 to vector<1x32xf32>
    %87 = arith.mulf %86, %85 : vector<1x32xf32>
    %cst_32 = arith.constant 1.000000e+00 : f32
    %88 = vector.broadcast %cst_32 : f32 to vector<1x32xf32>
    %89 = arith.subf %87, %88 : vector<1x32xf32>
    %90 = vector.extract_strided_slice %82 {offsets = [0, 96], sizes = [1, 32], strides = [1, 1]} : vector<1x128xf32> to vector<1x32xf32>
    %91 = arith.mulf %84, %66 : vector<1x32xf32>
    %92 = arith.mulf %83, %89 : vector<1x32xf32>
    %93 = arith.addf %91, %92 : vector<1x32xf32>
    %94 = math.tanh %93 : vector<1x32xf32>
    %95 = arith.mulf %90, %94 : vector<1x32xf32>
    %96 = arith.index_cast %c2_i32 : i32 to index
    %c0_33 = arith.constant 0 : index
    %97 = vector.load %arg8[%96, %c0_33] : memref<8x32xf32, #tpu.memory_space<vmem>>, vector<1x32xf32>
    tpu.vector_store %arg8[%96, %c0_33], %95 {strides = array<i32>} : memref<8x32xf32, #tpu.memory_space<vmem>>, vector<1x32xf32>,
    %c3_i32 = arith.constant 3 : i32
    %98 = arith.index_cast %c3_i32 : i32 to index
    %c0_34 = arith.constant 0 : index
    %99 = vector.load %arg9[%98, %c0_34] : memref<8x128xf32, #tpu.memory_space<vmem>>, vector<1x128xf32>
    %100 = arith.truncf %95 : vector<1x32xf32> to vector<1x32xbf16>
    %c0_35 = arith.constant 0 : index
    %c0_36 = arith.constant 0 : index
    %101 = vector.load %arg2[%c0_35, %c0_36] : memref<32x128xbf16, #tpu.memory_space<vmem>>, vector<32x128xbf16>
    %cst_37 = arith.constant dense<0.000000e+00> : vector<1x128xf32>
    %102 = tpu.matmul %100, %101, %cst_37 {dimension_numbers = #tpu.dot_dimension_numbers<[1], [0], [0], [1], [0, 0, 1, 1], [], []>} : vector<1x32xbf16>, vector<32x128xbf16>, vector<1x128xf32> -> vector<1x128xf32>
    %103 = arith.addf %99, %102 : vector<1x128xf32>
    %104 = arith.mulf %103, %15 : vector<1x128xf32>
    %105 = arith.negf %104 : vector<1x128xf32>
    %106 = math.exp %105 : vector<1x128xf32>
    %cst_38 = arith.constant 1.000000e+00 : f32
    %107 = vector.broadcast %cst_38 : f32 to vector<1x128xf32>
    %108 = arith.addf %107, %106 : vector<1x128xf32>
    %109 = arith.divf %107, %108 : vector<1x128xf32>
    %110 = vector.extract_strided_slice %109 {offsets = [0, 0], sizes = [1, 32], strides = [1, 1]} : vector<1x128xf32> to vector<1x32xf32>
    %111 = vector.extract_strided_slice %109 {offsets = [0, 32], sizes = [1, 32], strides = [1, 1]} : vector<1x128xf32> to vector<1x32xf32>
    %112 = vector.extract_strided_slice %109 {offsets = [0, 64], sizes = [1, 32], strides = [1, 1]} : vector<1x128xf32> to vector<1x32xf32>
    %cst_39 = arith.constant 2.000000e+00 : f32
    %113 = vector.broadcast %cst_39 : f32 to vector<1x32xf32>
    %114 = arith.mulf %113, %112 : vector<1x32xf32>
    %cst_40 = arith.constant 1.000000e+00 : f32
    %115 = vector.broadcast %cst_40 : f32 to vector<1x32xf32>
    %116 = arith.subf %114, %115 : vector<1x32xf32>
    %117 = vector.extract_strided_slice %109 {offsets = [0, 96], sizes = [1, 32], strides = [1, 1]} : vector<1x128xf32> to vector<1x32xf32>
    %118 = arith.mulf %111, %93 : vector<1x32xf32>
    %119 = arith.mulf %110, %116 : vector<1x32xf32>
    %120 = arith.addf %118, %119 : vector<1x32xf32>
    %121 = math.tanh %120 : vector<1x32xf32>
    %122 = arith.mulf %117, %121 : vector<1x32xf32>
    %123 = arith.index_cast %c3_i32 : i32 to index
    %c0_41 = arith.constant 0 : index
    %124 = vector.load %arg8[%123, %c0_41] : memref<8x32xf32, #tpu.memory_space<vmem>>, vector<1x32xf32>
    tpu.vector_store %arg8[%123, %c0_41], %122 {strides = array<i32>} : memref<8x32xf32, #tpu.memory_space<vmem>>, vector<1x32xf32>,
    %c4_i32 = arith.constant 4 : i32
    %125 = arith.index_cast %c4_i32 : i32 to index
    %c0_42 = arith.constant 0 : index
    %126 = vector.load %arg9[%125, %c0_42] : memref<8x128xf32, #tpu.memory_space<vmem>>, vector<1x128xf32>
    %127 = arith.truncf %122 : vector<1x32xf32> to vector<1x32xbf16>
    %c0_43 = arith.constant 0 : index
    %c0_44 = arith.constant 0 : index
    %128 = vector.load %arg2[%c0_43, %c0_44] : memref<32x128xbf16, #tpu.memory_space<vmem>>, vector<32x128xbf16>
    %cst_45 = arith.constant dense<0.000000e+00> : vector<1x128xf32>
    %129 = tpu.matmul %127, %128, %cst_45 {dimension_numbers = #tpu.dot_dimension_numbers<[1], [0], [0], [1], [0, 0, 1, 1], [], []>} : vector<1x32xbf16>, vector<32x128xbf16>, vector<1x128xf32> -> vector<1x128xf32>
    %130 = arith.addf %126, %129 : vector<1x128xf32>
    %131 = arith.mulf %130, %15 : vector<1x128xf32>
    %132 = arith.negf %131 : vector<1x128xf32>
    %133 = math.exp %132 : vector<1x128xf32>
    %cst_46 = arith.constant 1.000000e+00 : f32
    %134 = vector.broadcast %cst_46 : f32 to vector<1x128xf32>
    %135 = arith.addf %134, %133 : vector<1x128xf32>
    %136 = arith.divf %134, %135 : vector<1x128xf32>
    %137 = vector.extract_strided_slice %136 {offsets = [0, 0], sizes = [1, 32], strides = [1, 1]} : vector<1x128xf32> to vector<1x32xf32>
    %138 = vector.extract_strided_slice %136 {offsets = [0, 32], sizes = [1, 32], strides = [1, 1]} : vector<1x128xf32> to vector<1x32xf32>
    %139 = vector.extract_strided_slice %136 {offsets = [0, 64], sizes = [1, 32], strides = [1, 1]} : vector<1x128xf32> to vector<1x32xf32>
    %cst_47 = arith.constant 2.000000e+00 : f32
    %140 = vector.broadcast %cst_47 : f32 to vector<1x32xf32>
    %141 = arith.mulf %140, %139 : vector<1x32xf32>
    %cst_48 = arith.constant 1.000000e+00 : f32
    %142 = vector.broadcast %cst_48 : f32 to vector<1x32xf32>
    %143 = arith.subf %141, %142 : vector<1x32xf32>
    %144 = vector.extract_strided_slice %136 {offsets = [0, 96], sizes = [1, 32], strides = [1, 1]} : vector<1x128xf32> to vector<1x32xf32>
    %145 = arith.mulf %138, %120 : vector<1x32xf32>
    %146 = arith.mulf %137, %143 : vector<1x32xf32>
    %147 = arith.addf %145, %146 : vector<1x32xf32>
    %148 = math.tanh %147 : vector<1x32xf32>
    %149 = arith.mulf %144, %148 : vector<1x32xf32>
    %150 = arith.index_cast %c4_i32 : i32 to index
    %c0_49 = arith.constant 0 : index
    %151 = vector.load %arg8[%150, %c0_49] : memref<8x32xf32, #tpu.memory_space<vmem>>, vector<1x32xf32>
    tpu.vector_store %arg8[%150, %c0_49], %149 {strides = array<i32>} : memref<8x32xf32, #tpu.memory_space<vmem>>, vector<1x32xf32>,
    %c5_i32 = arith.constant 5 : i32
    %152 = arith.index_cast %c5_i32 : i32 to index
    %c0_50 = arith.constant 0 : index
    %153 = vector.load %arg9[%152, %c0_50] : memref<8x128xf32, #tpu.memory_space<vmem>>, vector<1x128xf32>
    %154 = arith.truncf %149 : vector<1x32xf32> to vector<1x32xbf16>
    %c0_51 = arith.constant 0 : index
    %c0_52 = arith.constant 0 : index
    %155 = vector.load %arg2[%c0_51, %c0_52] : memref<32x128xbf16, #tpu.memory_space<vmem>>, vector<32x128xbf16>
    %cst_53 = arith.constant dense<0.000000e+00> : vector<1x128xf32>
    %156 = tpu.matmul %154, %155, %cst_53 {dimension_numbers = #tpu.dot_dimension_numbers<[1], [0], [0], [1], [0, 0, 1, 1], [], []>} : vector<1x32xbf16>, vector<32x128xbf16>, vector<1x128xf32> -> vector<1x128xf32>
    %157 = arith.addf %153, %156 : vector<1x128xf32>
    %158 = arith.mulf %157, %15 : vector<1x128xf32>
    %159 = arith.negf %158 : vector<1x128xf32>
    %160 = math.exp %159 : vector<1x128xf32>
    %cst_54 = arith.constant 1.000000e+00 : f32
    %161 = vector.broadcast %cst_54 : f32 to vector<1x128xf32>
    %162 = arith.addf %161, %160 : vector<1x128xf32>
    %163 = arith.divf %161, %162 : vector<1x128xf32>
    %164 = vector.extract_strided_slice %163 {offsets = [0, 0], sizes = [1, 32], strides = [1, 1]} : vector<1x128xf32> to vector<1x32xf32>
    %165 = vector.extract_strided_slice %163 {offsets = [0, 32], sizes = [1, 32], strides = [1, 1]} : vector<1x128xf32> to vector<1x32xf32>
    %166 = vector.extract_strided_slice %163 {offsets = [0, 64], sizes = [1, 32], strides = [1, 1]} : vector<1x128xf32> to vector<1x32xf32>
    %cst_55 = arith.constant 2.000000e+00 : f32
    %167 = vector.broadcast %cst_55 : f32 to vector<1x32xf32>
    %168 = arith.mulf %167, %166 : vector<1x32xf32>
    %cst_56 = arith.constant 1.000000e+00 : f32
    %169 = vector.broadcast %cst_56 : f32 to vector<1x32xf32>
    %170 = arith.subf %168, %169 : vector<1x32xf32>
    %171 = vector.extract_strided_slice %163 {offsets = [0, 96], sizes = [1, 32], strides = [1, 1]} : vector<1x128xf32> to vector<1x32xf32>
    %172 = arith.mulf %165, %147 : vector<1x32xf32>
    %173 = arith.mulf %164, %170 : vector<1x32xf32>
    %174 = arith.addf %172, %173 : vector<1x32xf32>
    %175 = math.tanh %174 : vector<1x32xf32>
    %176 = arith.mulf %171, %175 : vector<1x32xf32>
    %177 = arith.index_cast %c5_i32 : i32 to index
    %c0_57 = arith.constant 0 : index
    %178 = vector.load %arg8[%177, %c0_57] : memref<8x32xf32, #tpu.memory_space<vmem>>, vector<1x32xf32>
    tpu.vector_store %arg8[%177, %c0_57], %176 {strides = array<i32>} : memref<8x32xf32, #tpu.memory_space<vmem>>, vector<1x32xf32>,
    %c6_i32 = arith.constant 6 : i32
    %179 = arith.index_cast %c6_i32 : i32 to index
    %c0_58 = arith.constant 0 : index
    %180 = vector.load %arg9[%179, %c0_58] : memref<8x128xf32, #tpu.memory_space<vmem>>, vector<1x128xf32>
    %181 = arith.truncf %176 : vector<1x32xf32> to vector<1x32xbf16>
    %c0_59 = arith.constant 0 : index
    %c0_60 = arith.constant 0 : index
    %182 = vector.load %arg2[%c0_59, %c0_60] : memref<32x128xbf16, #tpu.memory_space<vmem>>, vector<32x128xbf16>
    %cst_61 = arith.constant dense<0.000000e+00> : vector<1x128xf32>
    %183 = tpu.matmul %181, %182, %cst_61 {dimension_numbers = #tpu.dot_dimension_numbers<[1], [0], [0], [1], [0, 0, 1, 1], [], []>} : vector<1x32xbf16>, vector<32x128xbf16>, vector<1x128xf32> -> vector<1x128xf32>
    %184 = arith.addf %180, %183 : vector<1x128xf32>
    %185 = arith.mulf %184, %15 : vector<1x128xf32>
    %186 = arith.negf %185 : vector<1x128xf32>
    %187 = math.exp %186 : vector<1x128xf32>
    %cst_62 = arith.constant 1.000000e+00 : f32
    %188 = vector.broadcast %cst_62 : f32 to vector<1x128xf32>
    %189 = arith.addf %188, %187 : vector<1x128xf32>
    %190 = arith.divf %188, %189 : vector<1x128xf32>
    %191 = vector.extract_strided_slice %190 {offsets = [0, 0], sizes = [1, 32], strides = [1, 1]} : vector<1x128xf32> to vector<1x32xf32>
    %192 = vector.extract_strided_slice %190 {offsets = [0, 32], sizes = [1, 32], strides = [1, 1]} : vector<1x128xf32> to vector<1x32xf32>
    %193 = vector.extract_strided_slice %190 {offsets = [0, 64], sizes = [1, 32], strides = [1, 1]} : vector<1x128xf32> to vector<1x32xf32>
    %cst_63 = arith.constant 2.000000e+00 : f32
    %194 = vector.broadcast %cst_63 : f32 to vector<1x32xf32>
    %195 = arith.mulf %194, %193 : vector<1x32xf32>
    %cst_64 = arith.constant 1.000000e+00 : f32
    %196 = vector.broadcast %cst_64 : f32 to vector<1x32xf32>
    %197 = arith.subf %195, %196 : vector<1x32xf32>
    %198 = vector.extract_strided_slice %190 {offsets = [0, 96], sizes = [1, 32], strides = [1, 1]} : vector<1x128xf32> to vector<1x32xf32>
    %199 = arith.mulf %192, %174 : vector<1x32xf32>
    %200 = arith.mulf %191, %197 : vector<1x32xf32>
    %201 = arith.addf %199, %200 : vector<1x32xf32>
    %202 = math.tanh %201 : vector<1x32xf32>
    %203 = arith.mulf %198, %202 : vector<1x32xf32>
    %204 = arith.index_cast %c6_i32 : i32 to index
    %c0_65 = arith.constant 0 : index
    %205 = vector.load %arg8[%204, %c0_65] : memref<8x32xf32, #tpu.memory_space<vmem>>, vector<1x32xf32>
    tpu.vector_store %arg8[%204, %c0_65], %203 {strides = array<i32>} : memref<8x32xf32, #tpu.memory_space<vmem>>, vector<1x32xf32>,
    %c7_i32 = arith.constant 7 : i32
    %206 = arith.index_cast %c7_i32 : i32 to index
    %c0_66 = arith.constant 0 : index
    %207 = vector.load %arg9[%206, %c0_66] : memref<8x128xf32, #tpu.memory_space<vmem>>, vector<1x128xf32>
    %208 = arith.truncf %203 : vector<1x32xf32> to vector<1x32xbf16>
    %c0_67 = arith.constant 0 : index
    %c0_68 = arith.constant 0 : index
    %209 = vector.load %arg2[%c0_67, %c0_68] : memref<32x128xbf16, #tpu.memory_space<vmem>>, vector<32x128xbf16>
    %cst_69 = arith.constant dense<0.000000e+00> : vector<1x128xf32>
    %210 = tpu.matmul %208, %209, %cst_69 {dimension_numbers = #tpu.dot_dimension_numbers<[1], [0], [0], [1], [0, 0, 1, 1], [], []>} : vector<1x32xbf16>, vector<32x128xbf16>, vector<1x128xf32> -> vector<1x128xf32>
    %211 = arith.addf %207, %210 : vector<1x128xf32>
    %212 = arith.mulf %211, %15 : vector<1x128xf32>
    %213 = arith.negf %212 : vector<1x128xf32>
    %214 = math.exp %213 : vector<1x128xf32>
    %cst_70 = arith.constant 1.000000e+00 : f32
    %215 = vector.broadcast %cst_70 : f32 to vector<1x128xf32>
    %216 = arith.addf %215, %214 : vector<1x128xf32>
    %217 = arith.divf %215, %216 : vector<1x128xf32>
    %218 = vector.extract_strided_slice %217 {offsets = [0, 0], sizes = [1, 32], strides = [1, 1]} : vector<1x128xf32> to vector<1x32xf32>
    %219 = vector.extract_strided_slice %217 {offsets = [0, 32], sizes = [1, 32], strides = [1, 1]} : vector<1x128xf32> to vector<1x32xf32>
    %220 = vector.extract_strided_slice %217 {offsets = [0, 64], sizes = [1, 32], strides = [1, 1]} : vector<1x128xf32> to vector<1x32xf32>
    %cst_71 = arith.constant 2.000000e+00 : f32
    %221 = vector.broadcast %cst_71 : f32 to vector<1x32xf32>
    %222 = arith.mulf %221, %220 : vector<1x32xf32>
    %cst_72 = arith.constant 1.000000e+00 : f32
    %223 = vector.broadcast %cst_72 : f32 to vector<1x32xf32>
    %224 = arith.subf %222, %223 : vector<1x32xf32>
    %225 = vector.extract_strided_slice %217 {offsets = [0, 96], sizes = [1, 32], strides = [1, 1]} : vector<1x128xf32> to vector<1x32xf32>
    %226 = arith.mulf %219, %201 : vector<1x32xf32>
    %227 = arith.mulf %218, %224 : vector<1x32xf32>
    %228 = arith.addf %226, %227 : vector<1x32xf32>
    %229 = math.tanh %228 : vector<1x32xf32>
    %230 = arith.mulf %225, %229 : vector<1x32xf32>
    %231 = arith.index_cast %c7_i32 : i32 to index
    %c0_73 = arith.constant 0 : index
    %232 = vector.load %arg8[%231, %c0_73] : memref<8x32xf32, #tpu.memory_space<vmem>>, vector<1x32xf32>
    tpu.vector_store %arg8[%231, %c0_73], %230 {strides = array<i32>} : memref<8x32xf32, #tpu.memory_space<vmem>>, vector<1x32xf32>,
    %c8_i32 = arith.constant 8 : i32
    %c0_74 = arith.constant 0 : index
    %c0_75 = arith.constant 0 : index
    %233 = vector.load %arg8[%c0_74, %c0_75] : memref<8x32xf32, #tpu.memory_space<vmem>>, vector<8x32xf32>
    %234 = arith.truncf %233 : vector<8x32xf32> to vector<8x32xbf16>
    %c0_76 = arith.constant 0 : index
    %c0_77 = arith.constant 0 : index
    %235 = vector.load %arg4[%c0_76, %c0_77] : memref<32x128xbf16, #tpu.memory_space<vmem>>, vector<32x128xbf16>
    %cst_78 = arith.constant dense<0.000000e+00> : vector<8x128xf32>
    %236 = tpu.matmul %234, %235, %cst_78 {dimension_numbers = #tpu.dot_dimension_numbers<[1], [0], [0], [1], [0, 0, 1, 1], [], []>} : vector<8x32xbf16>, vector<32x128xbf16>, vector<8x128xf32> -> vector<8x128xf32>
    %c0_79 = arith.constant 0 : index
    %c0_80 = arith.constant 0 : index
    %237 = vector.load %arg6[%c0_79, %c0_80] : memref<1x128xf32, #tpu.memory_space<vmem>>, vector<1x128xf32>
    %238 = vector.broadcast %237 : vector<1x128xf32> to vector<8x128xf32>
    %239 = arith.addf %236, %238 : vector<8x128xf32>
    %c0_81 = arith.constant 0 : index
    %c0_82 = arith.constant 0 : index
    %240 = vector.load %arg9[%c0_81, %c0_82] : memref<8x128xf32, #tpu.memory_space<vmem>>, vector<8x128xf32>
    tpu.vector_store %arg9[%c0_81, %c0_82], %239 {strides = array<i32>} : memref<8x128xf32, #tpu.memory_space<vmem>>, vector<8x128xf32>,
    %241 = tpu.iota {dimensions = array<i32: 1>} : vector<1x128xi32>
    %c64_i32_83 = arith.constant 64 : i32
    %242 = vector.broadcast %c64_i32_83 : i32 to vector<1x128xi32>
    %243 = arith.cmpi sge, %241, %242 : vector<1x128xi32>
    %c96_i32_84 = arith.constant 96 : i32
    %244 = vector.broadcast %c96_i32_84 : i32 to vector<1x128xi32>
    %245 = arith.cmpi slt, %241, %244 : vector<1x128xi32>
    %246 = arith.andi %243, %245 : vector<1x128xi1>
    %cst_85 = arith.constant 2.000000e+00 : f32
    %cst_86 = arith.constant 1.000000e+00 : f32
    %247 = vector.broadcast %cst_85 : f32 to vector<1x128xf32>
    %248 = vector.broadcast %cst_86 : f32 to vector<1x128xf32>
    %249 = arith.select %246, %247, %248 : vector<1x128xi1>, vector<1x128xf32>
    %cst_87 = arith.constant 0.000000e+00 : f32
    %250 = vector.broadcast %cst_87 : f32 to vector<1x32xf32>
    %c0_i32_88 = arith.constant 0 : i32
    %251 = arith.index_cast %c0_i32_88 : i32 to index
    %c0_89 = arith.constant 0 : index
    %252 = vector.load %arg9[%251, %c0_89] : memref<8x128xf32, #tpu.memory_space<vmem>>, vector<1x128xf32>
    %253 = arith.truncf %250 : vector<1x32xf32> to vector<1x32xbf16>
    %c0_90 = arith.constant 0 : index
    %c0_91 = arith.constant 0 : index
    %254 = vector.load %arg5[%c0_90, %c0_91] : memref<32x128xbf16, #tpu.memory_space<vmem>>, vector<32x128xbf16>
    %cst_92 = arith.constant dense<0.000000e+00> : vector<1x128xf32>
    %255 = tpu.matmul %253, %254, %cst_92 {dimension_numbers = #tpu.dot_dimension_numbers<[1], [0], [0], [1], [0, 0, 1, 1], [], []>} : vector<1x32xbf16>, vector<32x128xbf16>, vector<1x128xf32> -> vector<1x128xf32>
    %256 = arith.addf %252, %255 : vector<1x128xf32>
    %257 = arith.mulf %256, %249 : vector<1x128xf32>
    %258 = arith.negf %257 : vector<1x128xf32>
    %259 = math.exp %258 : vector<1x128xf32>
    %cst_93 = arith.constant 1.000000e+00 : f32
    %260 = vector.broadcast %cst_93 : f32 to vector<1x128xf32>
    %261 = arith.addf %260, %259 : vector<1x128xf32>
    %262 = arith.divf %260, %261 : vector<1x128xf32>
    %263 = vector.extract_strided_slice %262 {offsets = [0, 0], sizes = [1, 32], strides = [1, 1]} : vector<1x128xf32> to vector<1x32xf32>
    %264 = vector.extract_strided_slice %262 {offsets = [0, 32], sizes = [1, 32], strides = [1, 1]} : vector<1x128xf32> to vector<1x32xf32>
    %265 = vector.extract_strided_slice %262 {offsets = [0, 64], sizes = [1, 32], strides = [1, 1]} : vector<1x128xf32> to vector<1x32xf32>
    %cst_94 = arith.constant 2.000000e+00 : f32
    %266 = vector.broadcast %cst_94 : f32 to vector<1x32xf32>
    %267 = arith.mulf %266, %265 : vector<1x32xf32>
    %cst_95 = arith.constant 1.000000e+00 : f32
    %268 = vector.broadcast %cst_95 : f32 to vector<1x32xf32>
    %269 = arith.subf %267, %268 : vector<1x32xf32>
    %270 = vector.extract_strided_slice %262 {offsets = [0, 96], sizes = [1, 32], strides = [1, 1]} : vector<1x128xf32> to vector<1x32xf32>
    %271 = arith.mulf %264, %250 : vector<1x32xf32>
    %272 = arith.mulf %263, %269 : vector<1x32xf32>
    %273 = arith.addf %271, %272 : vector<1x32xf32>
    %274 = math.tanh %273 : vector<1x32xf32>
    %275 = arith.mulf %270, %274 : vector<1x32xf32>
    %276 = arith.index_cast %c0_i32_88 : i32 to index
    %c0_96 = arith.constant 0 : index
    %277 = vector.load %arg8[%276, %c0_96] : memref<8x32xf32, #tpu.memory_space<vmem>>, vector<1x32xf32>
    tpu.vector_store %arg8[%276, %c0_96], %275 {strides = array<i32>} : memref<8x32xf32, #tpu.memory_space<vmem>>, vector<1x32xf32>,
    %c1_i32_97 = arith.constant 1 : i32
    %278 = arith.index_cast %c1_i32_97 : i32 to index
    %c0_98 = arith.constant 0 : index
    %279 = vector.load %arg9[%278, %c0_98] : memref<8x128xf32, #tpu.memory_space<vmem>>, vector<1x128xf32>
    %280 = arith.truncf %275 : vector<1x32xf32> to vector<1x32xbf16>
    %c0_99 = arith.constant 0 : index
    %c0_100 = arith.constant 0 : index
    %281 = vector.load %arg5[%c0_99, %c0_100] : memref<32x128xbf16, #tpu.memory_space<vmem>>, vector<32x128xbf16>
    %cst_101 = arith.constant dense<0.000000e+00> : vector<1x128xf32>
    %282 = tpu.matmul %280, %281, %cst_101 {dimension_numbers = #tpu.dot_dimension_numbers<[1], [0], [0], [1], [0, 0, 1, 1], [], []>} : vector<1x32xbf16>, vector<32x128xbf16>, vector<1x128xf32> -> vector<1x128xf32>
    %283 = arith.addf %279, %282 : vector<1x128xf32>
    %284 = arith.mulf %283, %249 : vector<1x128xf32>
    %285 = arith.negf %284 : vector<1x128xf32>
    %286 = math.exp %285 : vector<1x128xf32>
    %cst_102 = arith.constant 1.000000e+00 : f32
    %287 = vector.broadcast %cst_102 : f32 to vector<1x128xf32>
    %288 = arith.addf %287, %286 : vector<1x128xf32>
    %289 = arith.divf %287, %288 : vector<1x128xf32>
    %290 = vector.extract_strided_slice %289 {offsets = [0, 0], sizes = [1, 32], strides = [1, 1]} : vector<1x128xf32> to vector<1x32xf32>
    %291 = vector.extract_strided_slice %289 {offsets = [0, 32], sizes = [1, 32], strides = [1, 1]} : vector<1x128xf32> to vector<1x32xf32>
    %292 = vector.extract_strided_slice %289 {offsets = [0, 64], sizes = [1, 32], strides = [1, 1]} : vector<1x128xf32> to vector<1x32xf32>
    %cst_103 = arith.constant 2.000000e+00 : f32
    %293 = vector.broadcast %cst_103 : f32 to vector<1x32xf32>
    %294 = arith.mulf %293, %292 : vector<1x32xf32>
    %cst_104 = arith.constant 1.000000e+00 : f32
    %295 = vector.broadcast %cst_104 : f32 to vector<1x32xf32>
    %296 = arith.subf %294, %295 : vector<1x32xf32>
    %297 = vector.extract_strided_slice %289 {offsets = [0, 96], sizes = [1, 32], strides = [1, 1]} : vector<1x128xf32> to vector<1x32xf32>
    %298 = arith.mulf %291, %273 : vector<1x32xf32>
    %299 = arith.mulf %290, %296 : vector<1x32xf32>
    %300 = arith.addf %298, %299 : vector<1x32xf32>
    %301 = math.tanh %300 : vector<1x32xf32>
    %302 = arith.mulf %297, %301 : vector<1x32xf32>
    %303 = arith.index_cast %c1_i32_97 : i32 to index
    %c0_105 = arith.constant 0 : index
    %304 = vector.load %arg8[%303, %c0_105] : memref<8x32xf32, #tpu.memory_space<vmem>>, vector<1x32xf32>
    tpu.vector_store %arg8[%303, %c0_105], %302 {strides = array<i32>} : memref<8x32xf32, #tpu.memory_space<vmem>>, vector<1x32xf32>,
    %c2_i32_106 = arith.constant 2 : i32
    %305 = arith.index_cast %c2_i32_106 : i32 to index
    %c0_107 = arith.constant 0 : index
    %306 = vector.load %arg9[%305, %c0_107] : memref<8x128xf32, #tpu.memory_space<vmem>>, vector<1x128xf32>
    %307 = arith.truncf %302 : vector<1x32xf32> to vector<1x32xbf16>
    %c0_108 = arith.constant 0 : index
    %c0_109 = arith.constant 0 : index
    %308 = vector.load %arg5[%c0_108, %c0_109] : memref<32x128xbf16, #tpu.memory_space<vmem>>, vector<32x128xbf16>
    %cst_110 = arith.constant dense<0.000000e+00> : vector<1x128xf32>
    %309 = tpu.matmul %307, %308, %cst_110 {dimension_numbers = #tpu.dot_dimension_numbers<[1], [0], [0], [1], [0, 0, 1, 1], [], []>} : vector<1x32xbf16>, vector<32x128xbf16>, vector<1x128xf32> -> vector<1x128xf32>
    %310 = arith.addf %306, %309 : vector<1x128xf32>
    %311 = arith.mulf %310, %249 : vector<1x128xf32>
    %312 = arith.negf %311 : vector<1x128xf32>
    %313 = math.exp %312 : vector<1x128xf32>
    %cst_111 = arith.constant 1.000000e+00 : f32
    %314 = vector.broadcast %cst_111 : f32 to vector<1x128xf32>
    %315 = arith.addf %314, %313 : vector<1x128xf32>
    %316 = arith.divf %314, %315 : vector<1x128xf32>
    %317 = vector.extract_strided_slice %316 {offsets = [0, 0], sizes = [1, 32], strides = [1, 1]} : vector<1x128xf32> to vector<1x32xf32>
    %318 = vector.extract_strided_slice %316 {offsets = [0, 32], sizes = [1, 32], strides = [1, 1]} : vector<1x128xf32> to vector<1x32xf32>
    %319 = vector.extract_strided_slice %316 {offsets = [0, 64], sizes = [1, 32], strides = [1, 1]} : vector<1x128xf32> to vector<1x32xf32>
    %cst_112 = arith.constant 2.000000e+00 : f32
    %320 = vector.broadcast %cst_112 : f32 to vector<1x32xf32>
    %321 = arith.mulf %320, %319 : vector<1x32xf32>
    %cst_113 = arith.constant 1.000000e+00 : f32
    %322 = vector.broadcast %cst_113 : f32 to vector<1x32xf32>
    %323 = arith.subf %321, %322 : vector<1x32xf32>
    %324 = vector.extract_strided_slice %316 {offsets = [0, 96], sizes = [1, 32], strides = [1, 1]} : vector<1x128xf32> to vector<1x32xf32>
    %325 = arith.mulf %318, %300 : vector<1x32xf32>
    %326 = arith.mulf %317, %323 : vector<1x32xf32>
    %327 = arith.addf %325, %326 : vector<1x32xf32>
    %328 = math.tanh %327 : vector<1x32xf32>
    %329 = arith.mulf %324, %328 : vector<1x32xf32>
    %330 = arith.index_cast %c2_i32_106 : i32 to index
    %c0_114 = arith.constant 0 : index
    %331 = vector.load %arg8[%330, %c0_114] : memref<8x32xf32, #tpu.memory_space<vmem>>, vector<1x32xf32>
    tpu.vector_store %arg8[%330, %c0_114], %329 {strides = array<i32>} : memref<8x32xf32, #tpu.memory_space<vmem>>, vector<1x32xf32>,
    %c3_i32_115 = arith.constant 3 : i32
    %332 = arith.index_cast %c3_i32_115 : i32 to index
    %c0_116 = arith.constant 0 : index
    %333 = vector.load %arg9[%332, %c0_116] : memref<8x128xf32, #tpu.memory_space<vmem>>, vector<1x128xf32>
    %334 = arith.truncf %329 : vector<1x32xf32> to vector<1x32xbf16>
    %c0_117 = arith.constant 0 : index
    %c0_118 = arith.constant 0 : index
    %335 = vector.load %arg5[%c0_117, %c0_118] : memref<32x128xbf16, #tpu.memory_space<vmem>>, vector<32x128xbf16>
    %cst_119 = arith.constant dense<0.000000e+00> : vector<1x128xf32>
    %336 = tpu.matmul %334, %335, %cst_119 {dimension_numbers = #tpu.dot_dimension_numbers<[1], [0], [0], [1], [0, 0, 1, 1], [], []>} : vector<1x32xbf16>, vector<32x128xbf16>, vector<1x128xf32> -> vector<1x128xf32>
    %337 = arith.addf %333, %336 : vector<1x128xf32>
    %338 = arith.mulf %337, %249 : vector<1x128xf32>
    %339 = arith.negf %338 : vector<1x128xf32>
    %340 = math.exp %339 : vector<1x128xf32>
    %cst_120 = arith.constant 1.000000e+00 : f32
    %341 = vector.broadcast %cst_120 : f32 to vector<1x128xf32>
    %342 = arith.addf %341, %340 : vector<1x128xf32>
    %343 = arith.divf %341, %342 : vector<1x128xf32>
    %344 = vector.extract_strided_slice %343 {offsets = [0, 0], sizes = [1, 32], strides = [1, 1]} : vector<1x128xf32> to vector<1x32xf32>
    %345 = vector.extract_strided_slice %343 {offsets = [0, 32], sizes = [1, 32], strides = [1, 1]} : vector<1x128xf32> to vector<1x32xf32>
    %346 = vector.extract_strided_slice %343 {offsets = [0, 64], sizes = [1, 32], strides = [1, 1]} : vector<1x128xf32> to vector<1x32xf32>
    %cst_121 = arith.constant 2.000000e+00 : f32
    %347 = vector.broadcast %cst_121 : f32 to vector<1x32xf32>
    %348 = arith.mulf %347, %346 : vector<1x32xf32>
    %cst_122 = arith.constant 1.000000e+00 : f32
    %349 = vector.broadcast %cst_122 : f32 to vector<1x32xf32>
    %350 = arith.subf %348, %349 : vector<1x32xf32>
    %351 = vector.extract_strided_slice %343 {offsets = [0, 96], sizes = [1, 32], strides = [1, 1]} : vector<1x128xf32> to vector<1x32xf32>
    %352 = arith.mulf %345, %327 : vector<1x32xf32>
    %353 = arith.mulf %344, %350 : vector<1x32xf32>
    %354 = arith.addf %352, %353 : vector<1x32xf32>
    %355 = math.tanh %354 : vector<1x32xf32>
    %356 = arith.mulf %351, %355 : vector<1x32xf32>
    %357 = arith.index_cast %c3_i32_115 : i32 to index
    %c0_123 = arith.constant 0 : index
    %358 = vector.load %arg8[%357, %c0_123] : memref<8x32xf32, #tpu.memory_space<vmem>>, vector<1x32xf32>
    tpu.vector_store %arg8[%357, %c0_123], %356 {strides = array<i32>} : memref<8x32xf32, #tpu.memory_space<vmem>>, vector<1x32xf32>,
    %c4_i32_124 = arith.constant 4 : i32
    %359 = arith.index_cast %c4_i32_124 : i32 to index
    %c0_125 = arith.constant 0 : index
    %360 = vector.load %arg9[%359, %c0_125] : memref<8x128xf32, #tpu.memory_space<vmem>>, vector<1x128xf32>
    %361 = arith.truncf %356 : vector<1x32xf32> to vector<1x32xbf16>
    %c0_126 = arith.constant 0 : index
    %c0_127 = arith.constant 0 : index
    %362 = vector.load %arg5[%c0_126, %c0_127] : memref<32x128xbf16, #tpu.memory_space<vmem>>, vector<32x128xbf16>
    %cst_128 = arith.constant dense<0.000000e+00> : vector<1x128xf32>
    %363 = tpu.matmul %361, %362, %cst_128 {dimension_numbers = #tpu.dot_dimension_numbers<[1], [0], [0], [1], [0, 0, 1, 1], [], []>} : vector<1x32xbf16>, vector<32x128xbf16>, vector<1x128xf32> -> vector<1x128xf32>
    %364 = arith.addf %360, %363 : vector<1x128xf32>
    %365 = arith.mulf %364, %249 : vector<1x128xf32>
    %366 = arith.negf %365 : vector<1x128xf32>
    %367 = math.exp %366 : vector<1x128xf32>
    %cst_129 = arith.constant 1.000000e+00 : f32
    %368 = vector.broadcast %cst_129 : f32 to vector<1x128xf32>
    %369 = arith.addf %368, %367 : vector<1x128xf32>
    %370 = arith.divf %368, %369 : vector<1x128xf32>
    %371 = vector.extract_strided_slice %370 {offsets = [0, 0], sizes = [1, 32], strides = [1, 1]} : vector<1x128xf32> to vector<1x32xf32>
    %372 = vector.extract_strided_slice %370 {offsets = [0, 32], sizes = [1, 32], strides = [1, 1]} : vector<1x128xf32> to vector<1x32xf32>
    %373 = vector.extract_strided_slice %370 {offsets = [0, 64], sizes = [1, 32], strides = [1, 1]} : vector<1x128xf32> to vector<1x32xf32>
    %cst_130 = arith.constant 2.000000e+00 : f32
    %374 = vector.broadcast %cst_130 : f32 to vector<1x32xf32>
    %375 = arith.mulf %374, %373 : vector<1x32xf32>
    %cst_131 = arith.constant 1.000000e+00 : f32
    %376 = vector.broadcast %cst_131 : f32 to vector<1x32xf32>
    %377 = arith.subf %375, %376 : vector<1x32xf32>
    %378 = vector.extract_strided_slice %370 {offsets = [0, 96], sizes = [1, 32], strides = [1, 1]} : vector<1x128xf32> to vector<1x32xf32>
    %379 = arith.mulf %372, %354 : vector<1x32xf32>
    %380 = arith.mulf %371, %377 : vector<1x32xf32>
    %381 = arith.addf %379, %380 : vector<1x32xf32>
    %382 = math.tanh %381 : vector<1x32xf32>
    %383 = arith.mulf %378, %382 : vector<1x32xf32>
    %384 = arith.index_cast %c4_i32_124 : i32 to index
    %c0_132 = arith.constant 0 : index
    %385 = vector.load %arg8[%384, %c0_132] : memref<8x32xf32, #tpu.memory_space<vmem>>, vector<1x32xf32>
    tpu.vector_store %arg8[%384, %c0_132], %383 {strides = array<i32>} : memref<8x32xf32, #tpu.memory_space<vmem>>, vector<1x32xf32>,
    %c5_i32_133 = arith.constant 5 : i32
    %386 = arith.index_cast %c5_i32_133 : i32 to index
    %c0_134 = arith.constant 0 : index
    %387 = vector.load %arg9[%386, %c0_134] : memref<8x128xf32, #tpu.memory_space<vmem>>, vector<1x128xf32>
    %388 = arith.truncf %383 : vector<1x32xf32> to vector<1x32xbf16>
    %c0_135 = arith.constant 0 : index
    %c0_136 = arith.constant 0 : index
    %389 = vector.load %arg5[%c0_135, %c0_136] : memref<32x128xbf16, #tpu.memory_space<vmem>>, vector<32x128xbf16>
    %cst_137 = arith.constant dense<0.000000e+00> : vector<1x128xf32>
    %390 = tpu.matmul %388, %389, %cst_137 {dimension_numbers = #tpu.dot_dimension_numbers<[1], [0], [0], [1], [0, 0, 1, 1], [], []>} : vector<1x32xbf16>, vector<32x128xbf16>, vector<1x128xf32> -> vector<1x128xf32>
    %391 = arith.addf %387, %390 : vector<1x128xf32>
    %392 = arith.mulf %391, %249 : vector<1x128xf32>
    %393 = arith.negf %392 : vector<1x128xf32>
    %394 = math.exp %393 : vector<1x128xf32>
    %cst_138 = arith.constant 1.000000e+00 : f32
    %395 = vector.broadcast %cst_138 : f32 to vector<1x128xf32>
    %396 = arith.addf %395, %394 : vector<1x128xf32>
    %397 = arith.divf %395, %396 : vector<1x128xf32>
    %398 = vector.extract_strided_slice %397 {offsets = [0, 0], sizes = [1, 32], strides = [1, 1]} : vector<1x128xf32> to vector<1x32xf32>
    %399 = vector.extract_strided_slice %397 {offsets = [0, 32], sizes = [1, 32], strides = [1, 1]} : vector<1x128xf32> to vector<1x32xf32>
    %400 = vector.extract_strided_slice %397 {offsets = [0, 64], sizes = [1, 32], strides = [1, 1]} : vector<1x128xf32> to vector<1x32xf32>
    %cst_139 = arith.constant 2.000000e+00 : f32
    %401 = vector.broadcast %cst_139 : f32 to vector<1x32xf32>
    %402 = arith.mulf %401, %400 : vector<1x32xf32>
    %cst_140 = arith.constant 1.000000e+00 : f32
    %403 = vector.broadcast %cst_140 : f32 to vector<1x32xf32>
    %404 = arith.subf %402, %403 : vector<1x32xf32>
    %405 = vector.extract_strided_slice %397 {offsets = [0, 96], sizes = [1, 32], strides = [1, 1]} : vector<1x128xf32> to vector<1x32xf32>
    %406 = arith.mulf %399, %381 : vector<1x32xf32>
    %407 = arith.mulf %398, %404 : vector<1x32xf32>
    %408 = arith.addf %406, %407 : vector<1x32xf32>
    %409 = math.tanh %408 : vector<1x32xf32>
    %410 = arith.mulf %405, %409 : vector<1x32xf32>
    %411 = arith.index_cast %c5_i32_133 : i32 to index
    %c0_141 = arith.constant 0 : index
    %412 = vector.load %arg8[%411, %c0_141] : memref<8x32xf32, #tpu.memory_space<vmem>>, vector<1x32xf32>
    tpu.vector_store %arg8[%411, %c0_141], %410 {strides = array<i32>} : memref<8x32xf32, #tpu.memory_space<vmem>>, vector<1x32xf32>,
    %c6_i32_142 = arith.constant 6 : i32
    %413 = arith.index_cast %c6_i32_142 : i32 to index
    %c0_143 = arith.constant 0 : index
    %414 = vector.load %arg9[%413, %c0_143] : memref<8x128xf32, #tpu.memory_space<vmem>>, vector<1x128xf32>
    %415 = arith.truncf %410 : vector<1x32xf32> to vector<1x32xbf16>
    %c0_144 = arith.constant 0 : index
    %c0_145 = arith.constant 0 : index
    %416 = vector.load %arg5[%c0_144, %c0_145] : memref<32x128xbf16, #tpu.memory_space<vmem>>, vector<32x128xbf16>
    %cst_146 = arith.constant dense<0.000000e+00> : vector<1x128xf32>
    %417 = tpu.matmul %415, %416, %cst_146 {dimension_numbers = #tpu.dot_dimension_numbers<[1], [0], [0], [1], [0, 0, 1, 1], [], []>} : vector<1x32xbf16>, vector<32x128xbf16>, vector<1x128xf32> -> vector<1x128xf32>
    %418 = arith.addf %414, %417 : vector<1x128xf32>
    %419 = arith.mulf %418, %249 : vector<1x128xf32>
    %420 = arith.negf %419 : vector<1x128xf32>
    %421 = math.exp %420 : vector<1x128xf32>
    %cst_147 = arith.constant 1.000000e+00 : f32
    %422 = vector.broadcast %cst_147 : f32 to vector<1x128xf32>
    %423 = arith.addf %422, %421 : vector<1x128xf32>
    %424 = arith.divf %422, %423 : vector<1x128xf32>
    %425 = vector.extract_strided_slice %424 {offsets = [0, 0], sizes = [1, 32], strides = [1, 1]} : vector<1x128xf32> to vector<1x32xf32>
    %426 = vector.extract_strided_slice %424 {offsets = [0, 32], sizes = [1, 32], strides = [1, 1]} : vector<1x128xf32> to vector<1x32xf32>
    %427 = vector.extract_strided_slice %424 {offsets = [0, 64], sizes = [1, 32], strides = [1, 1]} : vector<1x128xf32> to vector<1x32xf32>
    %cst_148 = arith.constant 2.000000e+00 : f32
    %428 = vector.broadcast %cst_148 : f32 to vector<1x32xf32>
    %429 = arith.mulf %428, %427 : vector<1x32xf32>
    %cst_149 = arith.constant 1.000000e+00 : f32
    %430 = vector.broadcast %cst_149 : f32 to vector<1x32xf32>
    %431 = arith.subf %429, %430 : vector<1x32xf32>
    %432 = vector.extract_strided_slice %424 {offsets = [0, 96], sizes = [1, 32], strides = [1, 1]} : vector<1x128xf32> to vector<1x32xf32>
    %433 = arith.mulf %426, %408 : vector<1x32xf32>
    %434 = arith.mulf %425, %431 : vector<1x32xf32>
    %435 = arith.addf %433, %434 : vector<1x32xf32>
    %436 = math.tanh %435 : vector<1x32xf32>
    %437 = arith.mulf %432, %436 : vector<1x32xf32>
    %438 = arith.index_cast %c6_i32_142 : i32 to index
    %c0_150 = arith.constant 0 : index
    %439 = vector.load %arg8[%438, %c0_150] : memref<8x32xf32, #tpu.memory_space<vmem>>, vector<1x32xf32>
    tpu.vector_store %arg8[%438, %c0_150], %437 {strides = array<i32>} : memref<8x32xf32, #tpu.memory_space<vmem>>, vector<1x32xf32>,
    %c7_i32_151 = arith.constant 7 : i32
    %440 = arith.index_cast %c7_i32_151 : i32 to index
    %c0_152 = arith.constant 0 : index
    %441 = vector.load %arg9[%440, %c0_152] : memref<8x128xf32, #tpu.memory_space<vmem>>, vector<1x128xf32>
    %442 = arith.truncf %437 : vector<1x32xf32> to vector<1x32xbf16>
    %c0_153 = arith.constant 0 : index
    %c0_154 = arith.constant 0 : index
    %443 = vector.load %arg5[%c0_153, %c0_154] : memref<32x128xbf16, #tpu.memory_space<vmem>>, vector<32x128xbf16>
    %cst_155 = arith.constant dense<0.000000e+00> : vector<1x128xf32>
    %444 = tpu.matmul %442, %443, %cst_155 {dimension_numbers = #tpu.dot_dimension_numbers<[1], [0], [0], [1], [0, 0, 1, 1], [], []>} : vector<1x32xbf16>, vector<32x128xbf16>, vector<1x128xf32> -> vector<1x128xf32>
    %445 = arith.addf %441, %444 : vector<1x128xf32>
    %446 = arith.mulf %445, %249 : vector<1x128xf32>
    %447 = arith.negf %446 : vector<1x128xf32>
    %448 = math.exp %447 : vector<1x128xf32>
    %cst_156 = arith.constant 1.000000e+00 : f32
    %449 = vector.broadcast %cst_156 : f32 to vector<1x128xf32>
    %450 = arith.addf %449, %448 : vector<1x128xf32>
    %451 = arith.divf %449, %450 : vector<1x128xf32>
    %452 = vector.extract_strided_slice %451 {offsets = [0, 0], sizes = [1, 32], strides = [1, 1]} : vector<1x128xf32> to vector<1x32xf32>
    %453 = vector.extract_strided_slice %451 {offsets = [0, 32], sizes = [1, 32], strides = [1, 1]} : vector<1x128xf32> to vector<1x32xf32>
    %454 = vector.extract_strided_slice %451 {offsets = [0, 64], sizes = [1, 32], strides = [1, 1]} : vector<1x128xf32> to vector<1x32xf32>
    %cst_157 = arith.constant 2.000000e+00 : f32
    %455 = vector.broadcast %cst_157 : f32 to vector<1x32xf32>
    %456 = arith.mulf %455, %454 : vector<1x32xf32>
    %cst_158 = arith.constant 1.000000e+00 : f32
    %457 = vector.broadcast %cst_158 : f32 to vector<1x32xf32>
    %458 = arith.subf %456, %457 : vector<1x32xf32>
    %459 = vector.extract_strided_slice %451 {offsets = [0, 96], sizes = [1, 32], strides = [1, 1]} : vector<1x128xf32> to vector<1x32xf32>
    %460 = arith.mulf %453, %435 : vector<1x32xf32>
    %461 = arith.mulf %452, %458 : vector<1x32xf32>
    %462 = arith.addf %460, %461 : vector<1x32xf32>
    %463 = math.tanh %462 : vector<1x32xf32>
    %464 = arith.mulf %459, %463 : vector<1x32xf32>
    %465 = arith.index_cast %c7_i32_151 : i32 to index
    %c0_159 = arith.constant 0 : index
    %466 = vector.load %arg8[%465, %c0_159] : memref<8x32xf32, #tpu.memory_space<vmem>>, vector<1x32xf32>
    tpu.vector_store %arg8[%465, %c0_159], %464 {strides = array<i32>} : memref<8x32xf32, #tpu.memory_space<vmem>>, vector<1x32xf32>,
    %c8_i32_160 = arith.constant 8 : i32
    %c0_161 = arith.constant 0 : index
    %c0_162 = arith.constant 0 : index
    %467 = vector.load %arg8[%c0_161, %c0_162] : memref<8x32xf32, #tpu.memory_space<vmem>>, vector<8x32xf32>
    %468 = arith.truncf %467 : vector<8x32xf32> to vector<8x32xbf16>
    %c0_163 = arith.constant 0 : index
    %c0_164 = arith.constant 0 : index
    %469 = vector.load %arg7[%c0_163, %c0_164] : memref<8x32xbf16, #tpu.memory_space<vmem>>, vector<8x32xbf16>
    tpu.vector_store %arg7[%c0_163, %c0_164], %468 {strides = array<i32>} : memref<8x32xbf16, #tpu.memory_space<vmem>>, vector<8x32xbf16>,
    return
  }
}

</mosaic_0001>

<bundles_post_ra>
// kernel: seq2seq_forward.3
= control target key start
LH: loop header
LB: loop body
LE: loop exit
PB: predicated region body
PF: predicated region fallthrough
CT: control target
= control target key end

     0   :  { %v157_v1 = vmov 0.0   ;;  %vm158_vm0 = vmmov 0   ;;  %s204_s0 = inlined_call_operand.vmem [shape: bf16[8,32], index: 0, kind: input, shape index: {}]   ;;  %s205_s1 = inlined_call_operand.vmem [shape: bf16[32,128], index: 1, kind: input, shape index: {}]   ;;  %s206_s2 = inlined_call_operand.vmem [shape: f32[1,128], index: 2, kind: input, shape index: {}]   ;;  %s207_s3 = inlined_call_operand.hbm [shape: f32[8,128], index: 3, kind: output, shape index: {}]  }
   0x1   :  { %v127_v0 = vld [vmem:[%s205_s1] sm:$0xff]   ;;  %116 = vmatprep.subr.bf16.mxu0 %v157_v1  ;;  %v128_v2 = vld [vmem:[%s205_s1 + $0x8] sm:$0xff]   ;;  %120 = vmatprep.mubr.msk.bf16.mxu0 %vm158_vm0, %v157_v1 }
   0x2   :  { %117 = vmatpush3.bf16.msra.mxu0 %v127_v0 }
   0x3   :  { %118 = vmatprep.subr.bf16.mxu0 %v157_v1 }
   0x4   :  { %8 = vsyncpa [#allocation3], 0  ;;  %v16_v3 = vld [vmem:[%s204_s0] sm:$0xf]  ;;  %vm40_vm1 = vcmask 261120   ;;  %s159_s0 = smov [#allocation2]  }
   0x5   :  { %v109_v4 = vld [vmem:[%s206_s2] ss:$0 sm:$0xff]  ;;  %s101_s1 = sshll.u32 %s159_s0, 4  ;;  %s102_s1 = int_to_ptr.vmem [resolvable:$true] %s101_s1 }
   0x6   :  { %119 = vmatpush3.bf16.msra.mxu0 %v128_v2  ;;  %s133_s2 = scalar_lea.vmem %s102_s1, 128  ;;  %p138_p1 = scmp.lt.s32.totalorder %s102_s1, %s102_s1 }
   0x7   :  { %p134_p0 = scmp.ne.s32.totalorder %s102_s1, %s133_s2  ;;  %p139_p2 = scmp.lt.s32.totalorder %s133_s2, %s133_s2 }
   0x9   :  { %121 = vmatmul.mubr.msk.bf16.vlgmr.msra.gmra.mrb[0].mxu0 %vm40_vm1, %v16_v3  ;;  %p140_p3 = por %p139_p2, %p138_p1 }
   0xb   :  { %p141_p4 = pnand %p140_p3, %p134_p0 }
  0xdc   :  { %v78_v5 = vpop.f32.mrb[0].mxu0 }
  0xdd   :  { %v79_v6 = vadd.f32 %v109_v4, %v78_v5  ;;  %v122_v7 = vpop.f32.mrb[1].mxu0 }
  0xde   :  { %v81_v8 = vpop.f32.mrb[2].mxu0 }
  0xdf   :  { %84 = vmax.xlane.f32.xlu0 %v79_v6  ;;  %v123_v9 = vpop.f32.mrb[3].mxu0 }
 0x16c   :  { %v85_v10 = vpop.xlane.xlu0 %84 }
 0x16d   :  { %v86_v11 = vsub.f32 %v79_v6, %v85_v10 }
 0x16f   :  { %v87_v12 = vmul.f32 1.442695, %v86_v11 }
 0x171   :  { %129 = vpow2.f32 %v87_v12 }
 0x17b   :  { %v130_v13 = vpop.eup %129 }
 0x17c   :  { %89 = vadd.xlane.f32.xlu0 %v130_v13 }
 0x209   :  { %v90_v14 = vpop.xlane.xlu0 %89 }
 0x20a   :  { %131 = vlog2.f32 %v90_v14 }
 0x214   :  { %v132_v15 = vpop.eup %131 }
 0x215   :  { %v92_v16 = vmul.f32 0.6931472, %v132_v15 }
 0x217   :  { %v93_v17 = vsub.f32 %v86_v11, %v92_v16 }
 0x219   :  { %94 = vst [vmem:[#allocation2] sm:$0xff] %v93_v17 }
 0x21a   :  { %144 = shalt.err (!%p141_p4)
}
 0x21b   :  { %s145_s22 = scalar_lea.hbm %s207_s3, 128 }
 0x21c   :  { %p146_p5 = scmp.ne.s32.totalorder %s207_s3, %s145_s22  ;;  %p149_p6 = scmp.lt.u32.totalorder %s145_s22, %s207_s3 }
 0x21e   :  { %p151_p7 = pnand %p149_p6, %p146_p5 }
 0x220   :  { %154 = shalt.err (!%p151_p7)
}
 0x221   :  { %104 = dma.vmem_to_hbm [thread:$0]  %s102_s1, 128, %s207_s3, [#allocation3]  }
 0x222   :  { %155 = dma.done.wait [#allocation3], 128  }
 0x223   :  { %156 = vsyncadd [#allocation3], 4294967168 }
 0x224   :  { %108 = vsyncpa [#allocation3], 1 }

// kernel: seq2seq_forward.2
= control target key start
LH: loop header
LB: loop body
LE: loop exit
PB: predicated region body
PF: predicated region fallthrough
CT: control target
= control target key end

     0   :  { %vm40_vm0 = vcmask 1041408   ;;  %v2110_v0 = vmov 0.0   ;;  %vm2111_vm1 = vmmov 0   ;;  %vm36_vm2 = vcmask 31744   ;;  %s2115_s9 = smov 32   ;;  %s2533_s1 = inlined_call_operand.vmem [shape: bf16[4,128], index: 1, kind: input, shape index: {}]   ;;  %s2534_s0 = inlined_call_operand.vmem [shape: bf16[8,4], index: 0, kind: input, shape index: {}]   ;;  %s2535_s2 = inlined_call_operand.vmem [shape: bf16[32,128], index: 2, kind: input, shape index: {}]   ;;  %s2536_s3 = inlined_call_operand.vmem [shape: f32[1,128], index: 3, kind: input, shape index: {}]   ;;  %s2537_s4 = inlined_call_operand.vmem [shape: bf16[32,128], index: 4, kind: input, shape index: {}]   ;;  %s2538_s5 = inlined_call_operand.vmem [shape: bf16[32,128], index: 5, kind: input, shape index: {}]   ;;  %s2539_s6 = inlined_call_operand.vmem [shape: f32[1,128], index: 6, kind: input, shape index: {}]   ;;  %s2540_s7 = inlined_call_operand.vmem [shape: bf16[8,32], index: 7, kind: output, shape index: {}]  }
   0x1   :  { %1832 = vmatprep.subr.bf16.mxu0 %v2110_v0  ;;  %v28_v1 = vld [vmem:[%s2533_s1] sm:$0x3]  ;;  %1834 = vmatprep.mubr.msk.bf16.mxu0 %vm2111_vm1, %v2110_v0  ;;  %v1981_v5 = vld [vmem:[%s2535_s2 + $0x8] sm:$0xff]   ;;  %v2112_v6 = vmov 0   ;;  %v85_v7 = vlaneseq  ;;  %v2113_v19 = vmov 1.0   ;;  %vm108_vm6 = vcmask 261120  }
   0x2   :  { %v42_v2 = vsel %vm40_vm0, %v28_v1, 0  ;;  %1838 = vmatprep.subr.bf16.mxu1 %v2110_v0  ;;  %v1980_v3 = vld [vmem:[%s2535_s2] sm:$0xff]   ;;  %1842 = vmatprep.mubr.msk.bf16.mxu1 %vm2111_vm1, %v2110_v0  ;;  %v1983_v36 = vld [vmem:[%s2535_s2 + $0x8] sm:$0xff]   ;;  %vm183_vm7 = vcmask 253952   ;;  %vm1689_vm8 = vcmask 257024  }
   0x3   :  { %1833 = vmatpush3.bf16.msra.mxu0 %v42_v2  ;;  %v27_v4 = vld [vmem:[%s2534_s0] sm:$0xf]  ;;  %1839 = vmatpush3.bf16.msra.mxu1 %v1980_v3  ;;  %v86_v10 = vand.u32 127, %v85_v7  ;;  %v1985_v61 = vld [vmem:[%s2535_s2 + $0x8] sm:$0xff]  }
   0x4   :  { %1846 = vmatprep.subr.bf16.mxu0 %v2110_v0  ;;  %1840 = vmatprep.subr.bf16.mxu1 %v2110_v0  ;;  %v1695_v8 = vld [vmem:[%s2536_s3] ss:$0 sm:$0xff]  ;;  %s2114_s3 = smov 64  }
   0x5   :  { %vm87_vm3 = vcmp.ge.s32.totalorder %v86_v10, 64  ;;  %vm88_vm4 = vcmp.lt.s32.totalorder %v86_v10, 96  ;;  %v1982_v35 = vld [vmem:[%s2535_s2] sm:$0xff]  }
   0x6   :  { %1835 = vmatmul.mubr.msk.bf16.vlgmr.msra.gmra.mrb[0].mxu0 %vm36_vm2, %v27_v4  ;;  %vm89_vm5 = vmand %vm87_vm3, %vm88_vm4  ;;  %v1984_v60 = vld [vmem:[%s2535_s2] sm:$0xff]  }
   0x7   :  { %1850 = vmatprep.mubr.msk.bf16.mxu0 %vm2111_vm1, %v2110_v0  ;;  %1841 = vmatpush3.bf16.msra.mxu1 %v1981_v5  ;;  %v2185_v20 = vsel %vm89_vm5, 2.0, %v2113_v19 }
   0x8   :  { %1854 = vmatprep.subr.bf16.mxu1 %v2110_v0  ;;  %1847 = vmatpush3.bf16.msra.mxu0 %v1982_v35 }
   0x9   :  { %1848 = vmatprep.subr.bf16.mxu0 %v2110_v0 }
   0xa   :  { %1843 = vmatmul.mubr.bf16.vlgmr.msra.gmra.mrb[0].mxu1 %v2112_v6 }
   0xb   :  { %1858 = vmatprep.mubr.msk.bf16.mxu1 %vm2111_vm1, %v2110_v0  ;;  %1855 = vmatpush3.bf16.msra.mxu1 %v1984_v60 }
   0xc   :  { %1849 = vmatpush3.bf16.msra.mxu0 %v1983_v36  ;;  %1856 = vmatprep.subr.bf16.mxu1 %v2110_v0 }
   0xd   :  { %1862 = vmatprep.subr.bf16.mxu0 %v2110_v0 }
   0xf   :  { %1857 = vmatpush3.bf16.msra.mxu1 %v1985_v61 }
  0x10   :  { %1870 = vmatprep.subr.bf16.mxu1 %v2110_v0 }
  0xd9   :  { %v78_v9 = vpop.f32.mrb[0].mxu0 }
  0xda   :  { %v79_v11 = vadd.f32 %v1695_v8, %v78_v9  ;;  %v1836_v12 = vpop.f32.mrb[1].mxu0 }
  0xdb   :  { %v81_v13 = vpop.f32.mrb[2].mxu0 }
  0xdc   :  { %84 = vst [vmem:[#allocation3] sm:$0xff] %v79_v11  ;;  %v1837_v14 = vpop.f32.mrb[3].mxu0 }
  0xdd   :  { %v146_v15 = vpop.f32.mrb[0].mxu1 }
  0xde   :  { %v1844_v16 = vpop.f32.mrb[1].mxu1 }
  0xdf   :  { %v149_v17 = vpop.f32.mrb[2].mxu1 }
  0xe0   :  { %v1845_v18 = vpop.f32.mrb[3].mxu1 }
  0xe3   :  { %v91_v21 = vld [vmem:[#allocation3] sm:$0x1]  ;;  %v185_v42 = vld [vmem:[#allocation3 + $0x1] sm:$0x1]  ;;  %v281_v4 = vld [vmem:[#allocation3 + $0x2] sm:$0x1] }
  0xe4   :  { %v152_v22 = vadd.f32 %v146_v15, %v91_v21 }
  0xe6   :  { %v153_v23 = vmul.f32 %v152_v22, %v2185_v20 }
  0xe8   :  { %v1699_v24 = vmul.f32 -1.442695, %v153_v23 }
  0xea   :  { %2014 = vpow2.f32 %v1699_v24  ;;  %v1986_v24 = vld [vmem:[%s2535_s2] sm:$0xff]  }
  0xf4   :  { %v2015_v25 = vpop.eup %2014 }
  0xf5   :  { %v157_v26 = vadd.f32 1.0, %v2015_v25  ;;  %v1987_v25 = vld [vmem:[%s2535_s2 + $0x8] sm:$0xff]  }
  0xf7   :  { %2016 = vrcp.f32 %v157_v26 }
 0x101   :  { %v2017_v27 = vpop.eup %2016 }
 0x102   :  { %v160_v28 = vmul.f32 2.0, %v2017_v27  ;;  %v162_v32 = vmul.f32 0.0, %v2017_v27 }
 0x104   :  { %v1700_v29 = vadd.f32 -1.0, %v160_v28 }
 0x106   :  { %164 = vrot.lane.b32.xlu0 %v1700_v29, %s2114_s3 }
 0x178   :  { %v165_v30 = vpop.permute.xlu0 %164 }
 0x179   :  { %v167_v31 = vmul.f32 %v2017_v27, %v165_v30 }
 0x17b   :  { %169 = vrot.lane.b32.xlu0 %v167_v31, %s2115_s9  ;;  %v377_v31 = vld [vmem:[#allocation3 + $0x3] sm:$0x1] }
 0x1ed   :  { %v170_v33 = vpop.permute.xlu0 %169 }
 0x1ee   :  { %v172_v34 = vadd.f32 %v170_v33, %v162_v32 }
 0x1f0   :  { %2018 = vtanh.f32 %v172_v34 }
 0x1fa   :  { %v2019_v37 = vpop.eup %2018 }
 0x1fb   :  { %175 = vrot.lane.b32.xlu1 %v2019_v37, %s2114_s3 }
 0x26d   :  { %v176_v38 = vpop.permute.xlu1 %175 }
 0x26e   :  { %v2199_v39 = vmul.f32 %v2017_v27, %v176_v38 }
 0x270   :  { %v186_v40 = vpack.c.bf16 %v2199_v39, %v2199_v39 }
 0x272   :  { %192 = vrot.lane.b32.xlu1 %v186_v40, %s2115_s9 }
 0x2e4   :  { %v193_v41 = vpop.permute.xlu1 %192 }
 0x2e5   :  { %1851 = vmatmul.mubr.msk.bf16.vlgmr.msra.gmra.mrb[4].mxu0 %vm108_vm6, %v193_v41 }
 0x2e6   :  { %1866 = vmatprep.mubr.msk.bf16.mxu0 %vm2111_vm1, %v2110_v0  ;;  %1863 = vmatpush3.bf16.msra.mxu0 %v1986_v24 }
 0x2e7   :  { %1864 = vmatprep.subr.bf16.mxu0 %v2110_v0 }
 0x2ea   :  { %1865 = vmatpush3.bf16.msra.mxu0 %v1987_v25 }
 0x2eb   :  { %1878 = vmatprep.subr.bf16.mxu0 %v2110_v0 }
 0x3b8   :  { %v243_v43 = vpop.f32.mrb[4].mxu0 }
 0x3b9   :  { %v249_v44 = vadd.f32 %v243_v43, %v185_v42  ;;  %v1852_v45 = vpop.f32.mrb[5].mxu0 }
 0x3ba   :  { %v246_v46 = vpop.f32.mrb[6].mxu0 }
 0x3bb   :  { %v250_v47 = vmul.f32 %v249_v44, %v2185_v20  ;;  %v1853_v48 = vpop.f32.mrb[7].mxu0 }
 0x3bd   :  { %v1704_v49 = vmul.f32 -1.442695, %v250_v47 }
 0x3bf   :  { %2020 = vpow2.f32 %v1704_v49 }
 0x3c9   :  { %v2021_v50 = vpop.eup %2020 }
 0x3ca   :  { %v254_v51 = vadd.f32 1.0, %v2021_v50  ;;  %v1988_v50 = vld [vmem:[%s2535_s2] sm:$0xff]  }
 0x3cc   :  { %2022 = vrcp.f32 %v254_v51  ;;  %v1989_v51 = vld [vmem:[%s2535_s2 + $0x8] sm:$0xff]  }
 0x3d6   :  { %v2023_v52 = vpop.eup %2022 }
 0x3d7   :  { %v257_v53 = vmul.f32 2.0, %v2023_v52  ;;  %v259_v57 = vmul.f32 %v2023_v52, %v172_v34 }
 0x3d9   :  { %v1705_v54 = vadd.f32 -1.0, %v257_v53 }
 0x3db   :  { %261 = vrot.lane.b32.xlu0 %v1705_v54, %s2114_s3 }
 0x44d   :  { %v262_v55 = vpop.permute.xlu0 %261 }
 0x44e   :  { %v264_v56 = vmul.f32 %v2023_v52, %v262_v55 }
 0x450   :  { %266 = vrot.lane.b32.xlu1 %v264_v56, %s2115_s9 }
 0x4c2   :  { %v267_v58 = vpop.permute.xlu1 %266 }
 0x4c3   :  { %v269_v59 = vadd.f32 %v267_v58, %v259_v57  ;;  %v473_v57 = vld [vmem:[#allocation3 + $0x4] sm:$0x1] }
 0x4c5   :  { %2024 = vtanh.f32 %v269_v59 }
 0x4cf   :  { %v2025_v62 = vpop.eup %2024 }
 0x4d0   :  { %272 = vrot.lane.b32.xlu0 %v2025_v62, %s2114_s3 }
 0x542   :  { %v273_v63 = vpop.permute.xlu0 %272 }
 0x543   :  { %v2219_v1 = vmul.f32 %v2023_v52, %v273_v63 }
 0x545   :  { %v282_v2 = vpack.c.bf16 %v2219_v1, %v2219_v1 }
 0x547   :  { %288 = vrot.lane.b32.xlu1 %v282_v2, %s2115_s9 }
 0x5b9   :  { %v289_v3 = vpop.permute.xlu1 %288 }
 0x5ba   :  { %1859 = vmatmul.mubr.msk.bf16.vlgmr.msra.gmra.mrb[4].mxu1 %vm108_vm6, %v289_v3 }
 0x5bb   :  { %1874 = vmatprep.mubr.msk.bf16.mxu1 %vm2111_vm1, %v2110_v0  ;;  %1871 = vmatpush3.bf16.msra.mxu1 %v1988_v50 }
 0x5bc   :  { %1872 = vmatprep.subr.bf16.mxu1 %v2110_v0 }
 0x5bf   :  { %1873 = vmatpush3.bf16.msra.mxu1 %v1989_v51 }
 0x5c0   :  { %1886 = vmatprep.subr.bf16.mxu1 %v2110_v0 }
 0x68d   :  { %v339_v5 = vpop.f32.mrb[4].mxu1 }
 0x68e   :  { %v345_v7 = vadd.f32 %v339_v5, %v281_v4  ;;  %v1860_v8 = vpop.f32.mrb[5].mxu1 }
 0x68f   :  { %v342_v9 = vpop.f32.mrb[6].mxu1 }
 0x690   :  { %v346_v10 = vmul.f32 %v345_v7, %v2185_v20  ;;  %v1861_v11 = vpop.f32.mrb[7].mxu1 }
 0x692   :  { %v1709_v12 = vmul.f32 -1.442695, %v346_v10 }
 0x694   :  { %2026 = vpow2.f32 %v1709_v12 }
 0x69e   :  { %v2027_v13 = vpop.eup %2026 }
 0x69f   :  { %v350_v14 = vadd.f32 1.0, %v2027_v13 }
 0x6a1   :  { %2028 = vrcp.f32 %v350_v14  ;;  %v1990_v14 = vld [vmem:[%s2535_s2] sm:$0xff]  }
 0x6ab   :  { %v2029_v15 = vpop.eup %2028 }
 0x6ac   :  { %v353_v16 = vmul.f32 2.0, %v2029_v15  ;;  %v355_v21 = vmul.f32 %v2029_v15, %v269_v59 }
 0x6ae   :  { %v1710_v17 = vadd.f32 -1.0, %v353_v16 }
 0x6b0   :  { %357 = vrot.lane.b32.xlu0 %v1710_v17, %s2114_s3 }
 0x722   :  { %v358_v18 = vpop.permute.xlu0 %357 }
 0x723   :  { %v360_v19 = vmul.f32 %v2029_v15, %v358_v18 }
 0x725   :  { %362 = vrot.lane.b32.xlu1 %v360_v19, %s2115_s9 }
 0x797   :  { %v363_v22 = vpop.permute.xlu1 %362 }
 0x798   :  { %v365_v23 = vadd.f32 %v363_v22, %v355_v21  ;;  %v569_v22 = vld [vmem:[#allocation3 + $0x5] sm:$0x1] }
 0x79a   :  { %2030 = vtanh.f32 %v365_v23 }
 0x7a4   :  { %v2031_v26 = vpop.eup %2030 }
 0x7a5   :  { %368 = vrot.lane.b32.xlu0 %v2031_v26, %s2114_s3 }
 0x817   :  { %v369_v27 = vpop.permute.xlu0 %368 }
 0x818   :  { %v2239_v28 = vmul.f32 %v2029_v15, %v369_v27  ;;  %v1991_v15 = vld [vmem:[%s2535_s2 + $0x8] sm:$0xff]  }
 0x81a   :  { %v378_v29 = vpack.c.bf16 %v2239_v28, %v2239_v28 }
 0x81c   :  { %384 = vrot.lane.b32.xlu1 %v378_v29, %s2115_s9 }
 0x88e   :  { %v385_v30 = vpop.permute.xlu1 %384 }
 0x88f   :  { %1867 = vmatmul.mubr.msk.bf16.vlgmr.msra.gmra.mrb[8].mxu0 %vm108_vm6, %v385_v30 }
 0x890   :  { %1882 = vmatprep.mubr.msk.bf16.mxu0 %vm2111_vm1, %v2110_v0  ;;  %1879 = vmatpush3.bf16.msra.mxu0 %v1990_v14  ;;  %v761_v14 = vld [vmem:[#allocation3 + $0x7] sm:$0x1] }
 0x891   :  { %1880 = vmatprep.subr.bf16.mxu0 %v2110_v0 }
 0x894   :  { %1881 = vmatpush3.bf16.msra.mxu0 %v1991_v15 }
 0x895   :  { %1894 = vmatprep.subr.bf16.mxu0 %v2110_v0 }
 0x962   :  { %v435_v32 = vpop.f32.mrb[8].mxu0 }
 0x963   :  { %v441_v33 = vadd.f32 %v435_v32, %v377_v31  ;;  %v1868_v34 = vpop.f32.mrb[9].mxu0 }
 0x964   :  { %v438_v35 = vpop.f32.mrb[10].mxu0 }
 0x965   :  { %v442_v36 = vmul.f32 %v441_v33, %v2185_v20  ;;  %v1869_v37 = vpop.f32.mrb[11].mxu0 }
 0x967   :  { %v1714_v38 = vmul.f32 -1.442695, %v442_v36 }
 0x969   :  { %2032 = vpow2.f32 %v1714_v38 }
 0x973   :  { %v2033_v40 = vpop.eup %2032 }
 0x974   :  { %v446_v41 = vadd.f32 1.0, %v2033_v40 }
 0x976   :  { %2034 = vrcp.f32 %v446_v41 }
 0x980   :  { %v2035_v42 = vpop.eup %2034 }
 0x981   :  { %v449_v43 = vmul.f32 2.0, %v2035_v42  ;;  %v451_v47 = vmul.f32 %v2035_v42, %v365_v23 }
 0x983   :  { %v1715_v44 = vadd.f32 -1.0, %v449_v43  ;;  %v1993_v43 = vld [vmem:[%s2535_s2 + $0x8] sm:$0xff]  }
 0x985   :  { %453 = vrot.lane.b32.xlu0 %v1715_v44, %s2114_s3 }
 0x9f7   :  { %v454_v45 = vpop.permute.xlu0 %453 }
 0x9f8   :  { %v456_v46 = vmul.f32 %v2035_v42, %v454_v45 }
 0x9fa   :  { %458 = vrot.lane.b32.xlu1 %v456_v46, %s2115_s9 }
 0xa6c   :  { %v459_v48 = vpop.permute.xlu1 %458 }
 0xa6d   :  { %v461_v49 = vadd.f32 %v459_v48, %v451_v47 }
 0xa6f   :  { %2036 = vtanh.f32 %v461_v49 }
 0xa79   :  { %v2037_v52 = vpop.eup %2036 }
 0xa7a   :  { %464 = vrot.lane.b32.xlu0 %v2037_v52, %s2114_s3 }
 0xaec   :  { %v465_v53 = vpop.permute.xlu0 %464 }
 0xaed   :  { %v2259_v54 = vmul.f32 %v2035_v42, %v465_v53  ;;  %v1992_v42 = vld [vmem:[%s2535_s2] sm:$0xff]  }
 0xaef   :  { %v474_v55 = vpack.c.bf16 %v2259_v54, %v2259_v54 }
 0xaf1   :  { %480 = vrot.lane.b32.xlu1 %v474_v55, %s2115_s9 }
 0xb63   :  { %v481_v56 = vpop.permute.xlu1 %480 }
 0xb64   :  { %1875 = vmatmul.mubr.msk.bf16.vlgmr.msra.gmra.mrb[8].mxu1 %vm108_vm6, %v481_v56 }
 0xb65   :  { %1890 = vmatprep.mubr.msk.bf16.mxu1 %vm2111_vm1, %v2110_v0  ;;  %1887 = vmatpush3.bf16.msra.mxu1 %v1992_v42 }
 0xb66   :  { %1888 = vmatprep.subr.bf16.mxu1 %v2110_v0 }
 0xb69   :  { %1889 = vmatpush3.bf16.msra.mxu1 %v1993_v43 }
 0xb6a   :  { %1902 = vmatprep.subr.bf16.mxu1 %v2110_v0 }
 0xc37   :  { %v531_v58 = vpop.f32.mrb[8].mxu1 }
 0xc38   :  { %v537_v59 = vadd.f32 %v531_v58, %v473_v57  ;;  %v1876_v60 = vpop.f32.mrb[9].mxu1 }
 0xc39   :  { %v534_v61 = vpop.f32.mrb[10].mxu1 }
 0xc3a   :  { %v538_v62 = vmul.f32 %v537_v59, %v2185_v20  ;;  %v1877_v63 = vpop.f32.mrb[11].mxu1 }
 0xc3c   :  { %v1719_v2 = vmul.f32 -1.442695, %v538_v62 }
 0xc3e   :  { %2038 = vpow2.f32 %v1719_v2 }
 0xc48   :  { %v2039_v3 = vpop.eup %2038 }
 0xc49   :  { %v542_v4 = vadd.f32 1.0, %v2039_v3 }
 0xc4b   :  { %2040 = vrcp.f32 %v542_v4 }
 0xc55   :  { %v2041_v5 = vpop.eup %2040 }
 0xc56   :  { %v545_v7 = vmul.f32 2.0, %v2041_v5  ;;  %v547_v11 = vmul.f32 %v2041_v5, %v461_v49  ;;  %v665_v49 = vld [vmem:[#allocation3 + $0x6] sm:$0x1] }
 0xc58   :  { %v1720_v8 = vadd.f32 -1.0, %v545_v7  ;;  %v1994_v7 = vld [vmem:[%s2535_s2] sm:$0xff]  }
 0xc5a   :  { %549 = vrot.lane.b32.xlu0 %v1720_v8, %s2114_s3  ;;  %v1995_v8 = vld [vmem:[%s2535_s2 + $0x8] sm:$0xff]  }
 0xccc   :  { %v550_v9 = vpop.permute.xlu0 %549 }
 0xccd   :  { %v552_v10 = vmul.f32 %v2041_v5, %v550_v9 }
 0xccf   :  { %554 = vrot.lane.b32.xlu1 %v552_v10, %s2115_s9 }
 0xd41   :  { %v555_v12 = vpop.permute.xlu1 %554 }
 0xd42   :  { %v557_v13 = vadd.f32 %v555_v12, %v547_v11 }
 0xd44   :  { %2042 = vtanh.f32 %v557_v13 }
 0xd4e   :  { %v2043_v16 = vpop.eup %2042 }
 0xd4f   :  { %560 = vrot.lane.b32.xlu0 %v2043_v16, %s2114_s3 }
 0xdc1   :  { %v561_v17 = vpop.permute.xlu0 %560 }
 0xdc2   :  { %v2279_v18 = vmul.f32 %v2041_v5, %v561_v17 }
 0xdc4   :  { %v570_v19 = vpack.c.bf16 %v2279_v18, %v2279_v18 }
 0xdc6   :  { %576 = vrot.lane.b32.xlu1 %v570_v19, %s2115_s9 }
 0xe38   :  { %v577_v21 = vpop.permute.xlu1 %576 }
 0xe39   :  { %1883 = vmatmul.mubr.msk.bf16.vlgmr.msra.gmra.mrb[12].mxu0 %vm108_vm6, %v577_v21 }
 0xe3a   :  { %1898 = vmatprep.mubr.msk.bf16.mxu0 %vm2111_vm1, %v2110_v0  ;;  %1895 = vmatpush3.bf16.msra.mxu0 %v1994_v7 }
 0xe3b   :  { %1896 = vmatprep.subr.bf16.mxu0 %v2110_v0 }
 0xe3e   :  { %1897 = vmatpush3.bf16.msra.mxu0 %v1995_v8 }
 0xe3f   :  { %1910 = vmatprep.subr.bf16.mxu0 %v2110_v0 }
 0xf0c   :  { %v627_v23 = vpop.f32.mrb[12].mxu0 }
 0xf0d   :  { %v633_v24 = vadd.f32 %v627_v23, %v569_v22  ;;  %v1884_v25 = vpop.f32.mrb[13].mxu0 }
 0xf0e   :  { %v630_v26 = vpop.f32.mrb[14].mxu0 }
 0xf0f   :  { %v634_v27 = vmul.f32 %v633_v24, %v2185_v20  ;;  %v1885_v29 = vpop.f32.mrb[15].mxu0 }
 0xf11   :  { %v1724_v30 = vmul.f32 -1.442695, %v634_v27 }
 0xf13   :  { %2044 = vpow2.f32 %v1724_v30 }
 0xf1d   :  { %v2045_v31 = vpop.eup %2044 }
 0xf1e   :  { %v638_v32 = vadd.f32 1.0, %v2045_v31 }
 0xf20   :  { %2046 = vrcp.f32 %v638_v32 }
 0xf2a   :  { %v2047_v33 = vpop.eup %2046 }
 0xf2b   :  { %v641_v34 = vmul.f32 2.0, %v2047_v33  ;;  %v643_v38 = vmul.f32 %v2047_v33, %v557_v13 }
 0xf2d   :  { %v1725_v35 = vadd.f32 -1.0, %v641_v34 }
 0xf2f   :  { %645 = vrot.lane.b32.xlu0 %v1725_v35, %s2114_s3 }
 0xfa1   :  { %v646_v36 = vpop.permute.xlu0 %645 }
 0xfa2   :  { %v648_v37 = vmul.f32 %v2047_v33, %v646_v36 }
 0xfa4   :  { %650 = vrot.lane.b32.xlu1 %v648_v37, %s2115_s9 }
0x1016   :  { %v651_v40 = vpop.permute.xlu1 %650 }
0x1017   :  { %v653_v41 = vadd.f32 %v651_v40, %v643_v38  ;;  %v1997_v38 = vld [vmem:[%s2537_s4 + $0x8] sm:$0xff]  }
0x1019   :  { %2048 = vtanh.f32 %v653_v41 }
0x1023   :  { %v2049_v44 = vpop.eup %2048 }
0x1024   :  { %656 = vrot.lane.b32.xlu0 %v2049_v44, %s2114_s3 }
0x1096   :  { %v657_v45 = vpop.permute.xlu0 %656 }
0x1097   :  { %v2299_v46 = vmul.f32 %v2047_v33, %v657_v45 }
0x1099   :  { %v666_v47 = vpack.c.bf16 %v2299_v46, %v2299_v46 }
0x109b   :  { %672 = vrot.lane.b32.xlu1 %v666_v47, %s2115_s9 }
0x110d   :  { %v673_v48 = vpop.permute.xlu1 %672 }
0x110e   :  { %1891 = vmatmul.mubr.msk.bf16.vlgmr.msra.gmra.mrb[12].mxu1 %vm108_vm6, %v673_v48 }
0x110f   :  { %1906 = vmatprep.mubr.msk.bf16.mxu1 %vm2111_vm1, %v2110_v0 }
0x11e1   :  { %v723_v50 = vpop.f32.mrb[12].mxu1 }
0x11e2   :  { %v729_v51 = vadd.f32 %v723_v50, %v665_v49  ;;  %v1892_v52 = vpop.f32.mrb[13].mxu1 }
0x11e3   :  { %v726_v53 = vpop.f32.mrb[14].mxu1 }
0x11e4   :  { %v730_v55 = vmul.f32 %v729_v51, %v2185_v20  ;;  %v1893_v56 = vpop.f32.mrb[15].mxu1  ;;  %v1736_v51 = vld [vmem:[%s2539_s6] ss:$0 sm:$0xff] }
0x11e6   :  { %v1729_v57 = vmul.f32 -1.442695, %v730_v55 }
0x11e8   :  { %2050 = vpow2.f32 %v1729_v57 }
0x11f2   :  { %v2051_v58 = vpop.eup %2050 }
0x11f3   :  { %v734_v59 = vadd.f32 1.0, %v2051_v58 }
0x11f5   :  { %2052 = vrcp.f32 %v734_v59 }
0x11ff   :  { %v2053_v60 = vpop.eup %2052 }
0x1200   :  { %v737_v61 = vmul.f32 2.0, %v2053_v60  ;;  %v739_v3 = vmul.f32 %v2053_v60, %v653_v41  ;;  %v1999_v41 = vld [vmem:[%s2538_s5 + $0x8] sm:$0xff]  }
0x1202   :  { %v1730_v62 = vadd.f32 -1.0, %v737_v61 }
0x1204   :  { %741 = vrot.lane.b32.xlu0 %v1730_v62, %s2114_s3 }
0x1276   :  { %v742_v63 = vpop.permute.xlu0 %741 }
0x1277   :  { %v744_v2 = vmul.f32 %v2053_v60, %v742_v63 }
0x1279   :  { %746 = vrot.lane.b32.xlu1 %v744_v2, %s2115_s9 }
0x12eb   :  { %v747_v4 = vpop.permute.xlu1 %746 }
0x12ec   :  { %v749_v5 = vadd.f32 %v747_v4, %v739_v3 }
0x12ee   :  { %2054 = vtanh.f32 %v749_v5 }
0x12f8   :  { %v2055_v9 = vpop.eup %2054 }
0x12f9   :  { %752 = vrot.lane.b32.xlu0 %v2055_v9, %s2114_s3 }
0x136b   :  { %v753_v10 = vpop.permute.xlu0 %752 }
0x136c   :  { %v755_v11 = vmul.f32 %v2053_v60, %v753_v10 }
0x136e   :  { %v762_v12 = vpack.c.bf16 %v755_v11, %v755_v11 }
0x1370   :  { %768 = vrot.lane.b32.xlu1 %v762_v12, %s2115_s9  ;;  %v2001_v12 = vld [vmem:[%s2538_s5 + $0x8] sm:$0xff]  }
0x13e2   :  { %v769_v13 = vpop.permute.xlu1 %768 }
0x13e3   :  { %1899 = vmatmul.mubr.msk.bf16.vlgmr.msra.gmra.mrb[16].mxu0 %vm108_vm6, %v769_v13 }
0x13e4   :  { %1914 = vmatprep.mubr.msk.bf16.mxu0 %vm2111_vm1, %v2110_v0 }
0x14b6   :  { %v819_v15 = vpop.f32.mrb[16].mxu0 }
0x14b7   :  { %v825_v16 = vadd.f32 %v819_v15, %v761_v14  ;;  %v1900_v17 = vpop.f32.mrb[17].mxu0 }
0x14b8   :  { %v822_v19 = vpop.f32.mrb[18].mxu0 }
0x14b9   :  { %v826_v21 = vmul.f32 %v825_v16, %v2185_v20  ;;  %v1901_v22 = vpop.f32.mrb[19].mxu0 }
0x14bb   :  { %v1734_v23 = vmul.f32 -1.442695, %v826_v21 }
0x14bd   :  { %2056 = vpow2.f32 %v1734_v23 }
0x14c7   :  { %v2057_v24 = vpop.eup %2056 }
0x14c8   :  { %v830_v25 = vadd.f32 1.0, %v2057_v24 }
0x14ca   :  { %2058 = vrcp.f32 %v830_v25 }
0x14d4   :  { %v2059_v26 = vpop.eup %2058 }
0x14d5   :  { %v833_v27 = vmul.f32 2.0, %v2059_v26  ;;  %v835_v32 = vmul.f32 %v2059_v26, %v749_v5 }
0x14d7   :  { %v1735_v29 = vadd.f32 -1.0, %v833_v27 }
0x14d9   :  { %837 = vrot.lane.b32.xlu0 %v1735_v29, %s2114_s3 }
0x154b   :  { %v838_v30 = vpop.permute.xlu0 %837 }
0x154c   :  { %v840_v31 = vmul.f32 %v2059_v26, %v838_v30 }
0x154e   :  { %842 = vrot.lane.b32.xlu1 %v840_v31, %s2115_s9 }
0x1552   :  { %180 = vrot.lane.b32.xlu1 %v2199_v39, %s2115_s9 }
0x1556   :  { %373 = vrot.lane.b32.xlu1 %v2239_v28, %s2115_s9 }
0x155a   :  { %565 = vrot.lane.b32.xlu1 %v2279_v18, %s2115_s9  ;;  %v1996_v18 = vld [vmem:[%s2537_s4] sm:$0xff]  }
0x155b   :  { %1903 = vmatpush3.bf16.msra.mxu1 %v1996_v18  ;;  %v2003_v18 = vld [vmem:[%s2538_s5 + $0x8] sm:$0xff]  }
0x155c   :  { %1904 = vmatprep.subr.bf16.mxu1 %v2110_v0 }
0x155e   :  { %757 = vrot.lane.b32.xlu1 %v755_v11, %s2115_s9  ;;  %v2000_v11 = vld [vmem:[%s2538_s5] sm:$0xff]  }
0x155f   :  { %1905 = vmatpush3.bf16.msra.mxu1 %v1997_v38 }
0x1560   :  { %1918 = vmatprep.subr.bf16.mxu1 %v2110_v0 }
0x15c0   :  { %v843_v33 = vpop.permute.xlu1 %842 }
0x15c1   :  { %v845_v34 = vadd.f32 %v843_v33, %v835_v32 }
0x15c3   :  { %2060 = vtanh.f32 %v845_v34 }
0x15c4   :  { %v181_v35 = vpop.permute.xlu1 %180 }
0x15c5   :  { %184 = vst.msk [vmem:[#allocation2] sm:$0x1] %vm183_vm7, %v181_v35 }
0x15c8   :  { %v374_v36 = vpop.permute.xlu1 %373 }
0x15c9   :  { %376 = vst.msk [vmem:[#allocation2 + $0x2] sm:$0x1] %vm183_vm7, %v374_v36 }
0x15cc   :  { %v566_v39 = vpop.permute.xlu1 %565 }
0x15cd   :  { %v2061_v37 = vpop.eup %2060  ;;  %568 = vst.msk [vmem:[#allocation2 + $0x4] sm:$0x1] %vm183_vm7, %v566_v39 }
0x15ce   :  { %848 = vrot.lane.b32.xlu0 %v2061_v37, %s2114_s3 }
0x15d0   :  { %v758_v28 = vpop.permute.xlu1 %757 }
0x15d1   :  { %760 = vst.msk [vmem:[#allocation2 + $0x6] sm:$0x1] %vm183_vm7, %v758_v28  ;;  %v2002_v28 = vld [vmem:[%s2538_s5] sm:$0xff]  }
0x15d2   :  { %277 = vrot.lane.b32.xlu0 %v2219_v1, %s2115_s9 }
0x15d6   :  { %469 = vrot.lane.b32.xlu0 %v2259_v54, %s2115_s9  ;;  %v1998_v54 = vld [vmem:[%s2538_s5] sm:$0xff]  }
0x15d7   :  { %1911 = vmatpush3.bf16.msra.mxu0 %v1998_v54 }
0x15d8   :  { %1912 = vmatprep.subr.bf16.mxu0 %v2110_v0 }
0x15da   :  { %661 = vrot.lane.b32.xlu0 %v2299_v46, %s2115_s9 }
0x15db   :  { %1913 = vmatpush3.bf16.msra.mxu0 %v1999_v41 }
0x15dc   :  { %1926 = vmatprep.subr.bf16.mxu0 %v2110_v0 }
0x15de   :  { %1915 = vmatmul.mubr.bf16.vlgmr.msra.gmra.mrb[20].mxu0 %v2112_v6 }
0x15df   :  { %1930 = vmatprep.mubr.msk.bf16.mxu0 %vm2111_vm1, %v2110_v0  ;;  %1927 = vmatpush3.bf16.msra.mxu0 %v2002_v28 }
0x15e0   :  { %1928 = vmatprep.subr.bf16.mxu0 %v2110_v0 }
0x15e3   :  { %1929 = vmatpush3.bf16.msra.mxu0 %v2003_v18 }
0x15e4   :  { %1942 = vmatprep.subr.bf16.mxu0 %v2110_v0 }
0x1640   :  { %v849_v1 = vpop.permute.xlu0 %848 }
0x1641   :  { %v851_v40 = vmul.f32 %v2059_v26, %v849_v1 }
0x1643   :  { %853 = vrot.lane.b32.xlu0 %v851_v40, %s2115_s9 }
0x1644   :  { %v278_v42 = vpop.permute.xlu0 %277 }
0x1645   :  { %280 = vst.msk [vmem:[#allocation2 + $0x1] sm:$0x1] %vm183_vm7, %v278_v42 }
0x1648   :  { %v470_v43 = vpop.permute.xlu0 %469 }
0x1649   :  { %472 = vst.msk [vmem:[#allocation2 + $0x3] sm:$0x1] %vm183_vm7, %v470_v43 }
0x164c   :  { %v662_v44 = vpop.permute.xlu0 %661 }
0x164d   :  { %664 = vst.msk [vmem:[#allocation2 + $0x5] sm:$0x1] %vm183_vm7, %v662_v44 }
0x16b1   :  { %v977_v48 = vpop.f32.mrb[20].mxu0 }
0x16b2   :  { %v1916_v49 = vpop.f32.mrb[21].mxu0 }
0x16b3   :  { %v980_v50 = vpop.f32.mrb[22].mxu0 }
0x16b4   :  { %v1917_v6 = vpop.f32.mrb[23].mxu0 }
0x16b5   :  { %v854_v45 = vpop.permute.xlu0 %853 }
0x16b6   :  { %856 = vst.msk [vmem:[#allocation2 + $0x7] sm:$0x1] %vm183_vm7, %v854_v45 }
0x16bd   :  { %v857_v46 = vld [vmem:[#allocation2] sm:$0xff] }
0x16be   :  { %v858_v47 = vpack.c.bf16 %v857_v46, %v857_v46 }
0x16c0   :  { %1907 = vmatmul.mubr.msk.bf16.vlgmr.msra.gmra.mrb[16].mxu1 %vm108_vm6, %v858_v47 }
0x16c1   :  { %1922 = vmatprep.mubr.msk.bf16.mxu1 %vm2111_vm1, %v2110_v0  ;;  %1919 = vmatpush3.bf16.msra.mxu1 %v2000_v11 }
0x16c2   :  { %1920 = vmatprep.subr.bf16.mxu1 %v2110_v0 }
0x16c5   :  { %1921 = vmatpush3.bf16.msra.mxu1 %v2001_v12 }
0x16c6   :  { %1934 = vmatprep.subr.bf16.mxu1 %v2110_v0 }
0x1793   :  { %v919_v52 = vpop.f32.mrb[16].mxu1 }
0x1794   :  { %v920_v53 = vadd.f32 %v1736_v51, %v919_v52  ;;  %v1908_v55 = vpop.f32.mrb[17].mxu1 }
0x1795   :  { %v922_v56 = vpop.f32.mrb[18].mxu1 }
0x1796   :  { %925 = vst [vmem:[#allocation3] sm:$0xff] %v920_v53  ;;  %v1909_v57 = vpop.f32.mrb[19].mxu1 }
0x179d   :  { %v926_v58 = vld [vmem:[#allocation3] sm:$0x1]  ;;  %v1015_v19 = vld [vmem:[#allocation3 + $0x1] sm:$0x1]  ;;  %v1111_v42 = vld [vmem:[#allocation3 + $0x2] sm:$0x1] }
0x179e   :  { %v983_v59 = vadd.f32 %v977_v48, %v926_v58 }
0x17a0   :  { %v984_v60 = vmul.f32 %v983_v59, %v2185_v20 }
0x17a2   :  { %v1742_v61 = vmul.f32 -1.442695, %v984_v60  ;;  %v2004_v60 = vld [vmem:[%s2538_s5] sm:$0xff]  }
0x17a4   :  { %2062 = vpow2.f32 %v1742_v61  ;;  %v2005_v61 = vld [vmem:[%s2538_s5 + $0x8] sm:$0xff]  }
0x17ae   :  { %v2063_v62 = vpop.eup %2062 }
0x17af   :  { %v988_v63 = vadd.f32 1.0, %v2063_v62 }
0x17b1   :  { %2064 = vrcp.f32 %v988_v63 }
0x17bb   :  { %v2065_v2 = vpop.eup %2064 }
0x17bc   :  { %v991_v3 = vmul.f32 2.0, %v2065_v2  ;;  %v993_v8 = vmul.f32 0.0, %v2065_v2 }
0x17be   :  { %v1743_v4 = vadd.f32 -1.0, %v991_v3 }
0x17c0   :  { %995 = vrot.lane.b32.xlu1 %v1743_v4, %s2114_s3 }
0x1832   :  { %v996_v5 = vpop.permute.xlu1 %995 }
0x1833   :  { %v998_v7 = vmul.f32 %v2065_v2, %v996_v5  ;;  %v1207_v5 = vld [vmem:[#allocation3 + $0x3] sm:$0x1] }
0x1835   :  { %1000 = vrot.lane.b32.xlu0 %v998_v7, %s2115_s9 }
0x18a7   :  { %v1001_v9 = vpop.permute.xlu0 %1000 }
0x18a8   :  { %v1003_v10 = vadd.f32 %v1001_v9, %v993_v8 }
0x18aa   :  { %2066 = vtanh.f32 %v1003_v10 }
0x18b4   :  { %v2067_v13 = vpop.eup %2066 }
0x18b5   :  { %1006 = vrot.lane.b32.xlu1 %v2067_v13, %s2114_s3 }
0x1927   :  { %v1007_v14 = vpop.permute.xlu1 %1006 }
0x1928   :  { %v2386_v15 = vmul.f32 %v2065_v2, %v1007_v14 }
0x192a   :  { %v1016_v16 = vpack.c.bf16 %v2386_v15, %v2386_v15 }
0x192c   :  { %1022 = vrot.lane.b32.xlu0 %v1016_v16, %s2115_s9 }
0x199e   :  { %v1023_v17 = vpop.permute.xlu0 %1022 }
0x199f   :  { %1923 = vmatmul.mubr.msk.bf16.vlgmr.msra.gmra.mrb[20].mxu1 %vm108_vm6, %v1023_v17 }
0x19a0   :  { %1938 = vmatprep.mubr.msk.bf16.mxu1 %vm2111_vm1, %v2110_v0  ;;  %1935 = vmatpush3.bf16.msra.mxu1 %v2004_v60 }
0x19a1   :  { %1936 = vmatprep.subr.bf16.mxu1 %v2110_v0 }
0x19a4   :  { %1937 = vmatpush3.bf16.msra.mxu1 %v2005_v61 }
0x19a5   :  { %1950 = vmatprep.subr.bf16.mxu1 %v2110_v0 }
0x1a72   :  { %v1073_v21 = vpop.f32.mrb[20].mxu1 }
0x1a73   :  { %v1079_v22 = vadd.f32 %v1073_v21, %v1015_v19  ;;  %v1924_v23 = vpop.f32.mrb[21].mxu1 }
0x1a74   :  { %v1076_v24 = vpop.f32.mrb[22].mxu1 }
0x1a75   :  { %v1080_v25 = vmul.f32 %v1079_v22, %v2185_v20  ;;  %v1925_v26 = vpop.f32.mrb[23].mxu1 }
0x1a77   :  { %v1747_v27 = vmul.f32 -1.442695, %v1080_v25 }
0x1a79   :  { %2068 = vpow2.f32 %v1747_v27  ;;  %v2006_v27 = vld [vmem:[%s2538_s5] sm:$0xff]  }
0x1a83   :  { %v2069_v29 = vpop.eup %2068 }
0x1a84   :  { %v1084_v30 = vadd.f32 1.0, %v2069_v29  ;;  %v2007_v29 = vld [vmem:[%s2538_s5 + $0x8] sm:$0xff]  }
0x1a86   :  { %2070 = vrcp.f32 %v1084_v30 }
0x1a90   :  { %v2071_v31 = vpop.eup %2070 }
0x1a91   :  { %v1087_v32 = vmul.f32 2.0, %v2071_v31  ;;  %v1089_v36 = vmul.f32 %v2071_v31, %v1003_v10 }
0x1a93   :  { %v1748_v33 = vadd.f32 -1.0, %v1087_v32 }
0x1a95   :  { %1091 = vrot.lane.b32.xlu1 %v1748_v33, %s2114_s3 }
0x1b07   :  { %v1092_v34 = vpop.permute.xlu1 %1091 }
0x1b08   :  { %v1094_v35 = vmul.f32 %v2071_v31, %v1092_v34 }
0x1b0a   :  { %1096 = vrot.lane.b32.xlu0 %v1094_v35, %s2115_s9  ;;  %v1303_v35 = vld [vmem:[#allocation3 + $0x4] sm:$0x1] }
0x1b7c   :  { %v1097_v39 = vpop.permute.xlu0 %1096 }
0x1b7d   :  { %v1099_v37 = vadd.f32 %v1097_v39, %v1089_v36 }
0x1b7f   :  { %2072 = vtanh.f32 %v1099_v37 }
0x1b89   :  { %v2073_v38 = vpop.eup %2072 }
0x1b8a   :  { %1102 = vrot.lane.b32.xlu1 %v2073_v38, %s2114_s3 }
0x1bfc   :  { %v1103_v1 = vpop.permute.xlu1 %1102 }
0x1bfd   :  { %v2406_v54 = vmul.f32 %v2071_v31, %v1103_v1 }
0x1bff   :  { %v1112_v40 = vpack.c.bf16 %v2406_v54, %v2406_v54 }
0x1c01   :  { %1118 = vrot.lane.b32.xlu0 %v1112_v40, %s2115_s9 }
0x1c73   :  { %v1119_v41 = vpop.permute.xlu0 %1118 }
0x1c74   :  { %1931 = vmatmul.mubr.msk.bf16.vlgmr.msra.gmra.mrb[24].mxu0 %vm108_vm6, %v1119_v41 }
0x1c75   :  { %1946 = vmatprep.mubr.msk.bf16.mxu0 %vm2111_vm1, %v2110_v0  ;;  %1943 = vmatpush3.bf16.msra.mxu0 %v2006_v27 }
0x1c76   :  { %1944 = vmatprep.subr.bf16.mxu0 %v2110_v0 }
0x1c79   :  { %1945 = vmatpush3.bf16.msra.mxu0 %v2007_v29 }
0x1c7a   :  { %1958 = vmatprep.subr.bf16.mxu0 %v2110_v0 }
0x1d47   :  { %v1169_v43 = vpop.f32.mrb[24].mxu0 }
0x1d48   :  { %v1175_v44 = vadd.f32 %v1169_v43, %v1111_v42  ;;  %v1932_v45 = vpop.f32.mrb[25].mxu0 }
0x1d49   :  { %v1172_v46 = vpop.f32.mrb[26].mxu0 }
0x1d4a   :  { %v1176_v47 = vmul.f32 %v1175_v44, %v2185_v20  ;;  %v1933_v48 = vpop.f32.mrb[27].mxu0 }
0x1d4c   :  { %v1752_v49 = vmul.f32 -1.442695, %v1176_v47 }
0x1d4e   :  { %2074 = vpow2.f32 %v1752_v49 }
0x1d58   :  { %v2075_v50 = vpop.eup %2074 }
0x1d59   :  { %v1180_v6 = vadd.f32 1.0, %v2075_v50  ;;  %v2008_v50 = vld [vmem:[%s2538_s5] sm:$0xff]  }
0x1d5b   :  { %2076 = vrcp.f32 %v1180_v6  ;;  %v2009_v6 = vld [vmem:[%s2538_s5 + $0x8] sm:$0xff]  }
0x1d65   :  { %v2077_v51 = vpop.eup %2076 }
0x1d66   :  { %v1183_v52 = vmul.f32 2.0, %v2077_v51  ;;  %v1185_v57 = vmul.f32 %v2077_v51, %v1099_v37 }
0x1d68   :  { %v1753_v53 = vadd.f32 -1.0, %v1183_v52 }
0x1d6a   :  { %1187 = vrot.lane.b32.xlu1 %v1753_v53, %s2114_s3 }
0x1ddc   :  { %v1188_v55 = vpop.permute.xlu1 %1187 }
0x1ddd   :  { %v1190_v56 = vmul.f32 %v2077_v51, %v1188_v55 }
0x1ddf   :  { %1192 = vrot.lane.b32.xlu0 %v1190_v56, %s2115_s9 }
0x1e51   :  { %v1193_v58 = vpop.permute.xlu0 %1192 }
0x1e52   :  { %v1195_v59 = vadd.f32 %v1193_v58, %v1185_v57  ;;  %v1399_v57 = vld [vmem:[#allocation3 + $0x5] sm:$0x1] }
0x1e54   :  { %2078 = vtanh.f32 %v1195_v59 }
0x1e5e   :  { %v2079_v62 = vpop.eup %2078 }
0x1e5f   :  { %1198 = vrot.lane.b32.xlu1 %v2079_v62, %s2114_s3 }
0x1ed1   :  { %v1199_v63 = vpop.permute.xlu1 %1198 }
0x1ed2   :  { %v2426_v2 = vmul.f32 %v2077_v51, %v1199_v63 }
0x1ed4   :  { %v1208_v3 = vpack.c.bf16 %v2426_v2, %v2426_v2 }
0x1ed6   :  { %1214 = vrot.lane.b32.xlu0 %v1208_v3, %s2115_s9 }
0x1f48   :  { %v1215_v4 = vpop.permute.xlu0 %1214 }
0x1f49   :  { %1939 = vmatmul.mubr.msk.bf16.vlgmr.msra.gmra.mrb[24].mxu1 %vm108_vm6, %v1215_v4 }
0x1f4a   :  { %1954 = vmatprep.mubr.msk.bf16.mxu1 %vm2111_vm1, %v2110_v0  ;;  %1951 = vmatpush3.bf16.msra.mxu1 %v2008_v50 }
0x1f4b   :  { %1952 = vmatprep.subr.bf16.mxu1 %v2110_v0 }
0x1f4e   :  { %1953 = vmatpush3.bf16.msra.mxu1 %v2009_v6 }
0x1f4f   :  { %1966 = vmatprep.subr.bf16.mxu1 %v2110_v0 }
0x201c   :  { %v1265_v7 = vpop.f32.mrb[24].mxu1 }
0x201d   :  { %v1271_v8 = vadd.f32 %v1265_v7, %v1207_v5  ;;  %v1940_v9 = vpop.f32.mrb[25].mxu1 }
0x201e   :  { %v1268_v10 = vpop.f32.mrb[26].mxu1 }
0x201f   :  { %v1272_v11 = vmul.f32 %v1271_v8, %v2185_v20  ;;  %v1941_v12 = vpop.f32.mrb[27].mxu1 }
0x2021   :  { %v1757_v13 = vmul.f32 -1.442695, %v1272_v11 }
0x2023   :  { %2080 = vpow2.f32 %v1757_v13 }
0x202d   :  { %v2081_v14 = vpop.eup %2080 }
0x202e   :  { %v1276_v16 = vadd.f32 1.0, %v2081_v14 }
0x2030   :  { %2082 = vrcp.f32 %v1276_v16  ;;  %v2010_v16 = vld [vmem:[%s2538_s5] sm:$0xff]  }
0x203a   :  { %v2083_v17 = vpop.eup %2082 }
0x203b   :  { %v1279_v19 = vmul.f32 2.0, %v2083_v17  ;;  %v1281_v24 = vmul.f32 %v2083_v17, %v1195_v59 }
0x203d   :  { %v1758_v21 = vadd.f32 -1.0, %v1279_v19 }
0x203f   :  { %1283 = vrot.lane.b32.xlu1 %v1758_v21, %s2114_s3 }
0x20b1   :  { %v1284_v22 = vpop.permute.xlu1 %1283 }
0x20b2   :  { %v1286_v23 = vmul.f32 %v2083_v17, %v1284_v22 }
0x20b4   :  { %1288 = vrot.lane.b32.xlu0 %v1286_v23, %s2115_s9 }
0x2126   :  { %v1289_v25 = vpop.permute.xlu0 %1288 }
0x2127   :  { %v1291_v26 = vadd.f32 %v1289_v25, %v1281_v24  ;;  %v1495_v25 = vld [vmem:[#allocation3 + $0x6] sm:$0x1] }
0x2129   :  { %2084 = vtanh.f32 %v1291_v26 }
0x2133   :  { %v2085_v30 = vpop.eup %2084 }
0x2134   :  { %1294 = vrot.lane.b32.xlu1 %v2085_v30, %s2114_s3 }
0x21a6   :  { %v1295_v31 = vpop.permute.xlu1 %1294 }
0x21a7   :  { %v2446_v32 = vmul.f32 %v2083_v17, %v1295_v31  ;;  %v2011_v17 = vld [vmem:[%s2538_s5 + $0x8] sm:$0xff]  }
0x21a9   :  { %v1304_v33 = vpack.c.bf16 %v2446_v32, %v2446_v32 }
0x21ab   :  { %1310 = vrot.lane.b32.xlu0 %v1304_v33, %s2115_s9 }
0x221d   :  { %v1311_v34 = vpop.permute.xlu0 %1310 }
0x221e   :  { %1947 = vmatmul.mubr.msk.bf16.vlgmr.msra.gmra.mrb[28].mxu0 %vm108_vm6, %v1311_v34 }
0x221f   :  { %1962 = vmatprep.mubr.msk.bf16.mxu0 %vm2111_vm1, %v2110_v0  ;;  %1959 = vmatpush3.bf16.msra.mxu0 %v2010_v16 }
0x2220   :  { %1960 = vmatprep.subr.bf16.mxu0 %v2110_v0 }
0x2223   :  { %1961 = vmatpush3.bf16.msra.mxu0 %v2011_v17 }
0x22f1   :  { %v1361_v36 = vpop.f32.mrb[28].mxu0 }
0x22f2   :  { %v1367_v39 = vadd.f32 %v1361_v36, %v1303_v35  ;;  %v1948_v37 = vpop.f32.mrb[29].mxu0 }
0x22f3   :  { %v1364_v28 = vpop.f32.mrb[30].mxu0 }
0x22f4   :  { %v1368_v18 = vmul.f32 %v1367_v39, %v2185_v20  ;;  %v1949_v38 = vpop.f32.mrb[31].mxu0 }
0x22f6   :  { %v1762_v1 = vmul.f32 -1.442695, %v1368_v18 }
0x22f8   :  { %2086 = vpow2.f32 %v1762_v1 }
0x2302   :  { %v2087_v40 = vpop.eup %2086 }
0x2303   :  { %v1372_v41 = vadd.f32 1.0, %v2087_v40 }
0x2305   :  { %2088 = vrcp.f32 %v1372_v41 }
0x230f   :  { %v2089_v42 = vpop.eup %2088 }
0x2310   :  { %v1375_v43 = vmul.f32 2.0, %v2089_v42  ;;  %v1377_v47 = vmul.f32 %v2089_v42, %v1291_v26 }
0x2312   :  { %v1763_v44 = vadd.f32 -1.0, %v1375_v43  ;;  %v2013_v43 = vld [vmem:[%s2538_s5 + $0x8] sm:$0xff]  }
0x2314   :  { %1379 = vrot.lane.b32.xlu1 %v1763_v44, %s2114_s3 }
0x2386   :  { %v1380_v45 = vpop.permute.xlu1 %1379 }
0x2387   :  { %v1382_v46 = vmul.f32 %v2089_v42, %v1380_v45 }
0x2389   :  { %1384 = vrot.lane.b32.xlu0 %v1382_v46, %s2115_s9 }
0x23fb   :  { %v1385_v48 = vpop.permute.xlu0 %1384 }
0x23fc   :  { %v1387_v49 = vadd.f32 %v1385_v48, %v1377_v47 }
0x23fe   :  { %2090 = vtanh.f32 %v1387_v49 }
0x2408   :  { %v2091_v51 = vpop.eup %2090 }
0x2409   :  { %1390 = vrot.lane.b32.xlu1 %v2091_v51, %s2114_s3 }
0x247b   :  { %v1391_v52 = vpop.permute.xlu1 %1390 }
0x247c   :  { %v2466_v53 = vmul.f32 %v2089_v42, %v1391_v52  ;;  %v2012_v42 = vld [vmem:[%s2538_s5] sm:$0xff]  }
0x247e   :  { %v1400_v55 = vpack.c.bf16 %v2466_v53, %v2466_v53 }
0x2480   :  { %1406 = vrot.lane.b32.xlu0 %v1400_v55, %s2115_s9 }
0x24f2   :  { %v1407_v56 = vpop.permute.xlu0 %1406 }
0x24f3   :  { %1955 = vmatmul.mubr.msk.bf16.vlgmr.msra.gmra.mrb[28].mxu1 %vm108_vm6, %v1407_v56 }
0x24f4   :  { %1970 = vmatprep.mubr.msk.bf16.mxu1 %vm2111_vm1, %v2110_v0  ;;  %1967 = vmatpush3.bf16.msra.mxu1 %v2012_v42 }
0x24f5   :  { %1968 = vmatprep.subr.bf16.mxu1 %v2110_v0 }
0x24f8   :  { %1969 = vmatpush3.bf16.msra.mxu1 %v2013_v43 }
0x25c6   :  { %v1457_v58 = vpop.f32.mrb[28].mxu1 }
0x25c7   :  { %v1463_v59 = vadd.f32 %v1457_v58, %v1399_v57  ;;  %v1956_v60 = vpop.f32.mrb[29].mxu1 }
0x25c8   :  { %v1460_v61 = vpop.f32.mrb[30].mxu1 }
0x25c9   :  { %v1464_v62 = vmul.f32 %v1463_v59, %v2185_v20  ;;  %v1957_v63 = vpop.f32.mrb[31].mxu1 }
0x25cb   :  { %v1767_v3 = vmul.f32 -1.442695, %v1464_v62 }
0x25cd   :  { %2092 = vpow2.f32 %v1767_v3 }
0x25d7   :  { %v2093_v4 = vpop.eup %2092 }
0x25d8   :  { %v1468_v5 = vadd.f32 1.0, %v2093_v4 }
0x25da   :  { %2094 = vrcp.f32 %v1468_v5 }
0x25e4   :  { %v2095_v7 = vpop.eup %2094 }
0x25e5   :  { %v1471_v8 = vmul.f32 2.0, %v2095_v7  ;;  %v1473_v12 = vmul.f32 %v2095_v7, %v1387_v49  ;;  %v1591_v49 = vld [vmem:[#allocation3 + $0x7] sm:$0x1] }
0x25e7   :  { %v1768_v9 = vadd.f32 -1.0, %v1471_v8 }
0x25e9   :  { %1475 = vrot.lane.b32.xlu1 %v1768_v9, %s2114_s3 }
0x265b   :  { %v1476_v10 = vpop.permute.xlu1 %1475 }
0x265c   :  { %v1478_v11 = vmul.f32 %v2095_v7, %v1476_v10 }
0x265e   :  { %1480 = vrot.lane.b32.xlu0 %v1478_v11, %s2115_s9 }
0x26d0   :  { %v1481_v13 = vpop.permute.xlu0 %1480 }
0x26d1   :  { %v1483_v14 = vadd.f32 %v1481_v13, %v1473_v12 }
0x26d3   :  { %2096 = vtanh.f32 %v1483_v14 }
0x26dd   :  { %v2097_v19 = vpop.eup %2096 }
0x26de   :  { %1486 = vrot.lane.b32.xlu1 %v2097_v19, %s2114_s3 }
0x2750   :  { %v1487_v21 = vpop.permute.xlu1 %1486 }
0x2751   :  { %v2485_v22 = vmul.f32 %v2095_v7, %v1487_v21 }
0x2753   :  { %v1496_v23 = vpack.c.bf16 %v2485_v22, %v2485_v22 }
0x2755   :  { %1502 = vrot.lane.b32.xlu0 %v1496_v23, %s2115_s9 }
0x27c7   :  { %v1503_v24 = vpop.permute.xlu0 %1502 }
0x27c8   :  { %1963 = vmatmul.mubr.msk.bf16.vlgmr.msra.gmra.mrb[32].mxu0 %vm108_vm6, %v1503_v24 }
0x289b   :  { %v1553_v26 = vpop.f32.mrb[32].mxu0 }
0x289c   :  { %v1559_v27 = vadd.f32 %v1553_v26, %v1495_v25  ;;  %v1964_v29 = vpop.f32.mrb[33].mxu0 }
0x289d   :  { %v1556_v30 = vpop.f32.mrb[34].mxu0 }
0x289e   :  { %v1560_v31 = vmul.f32 %v1559_v27, %v2185_v20  ;;  %v1965_v33 = vpop.f32.mrb[35].mxu0 }
0x28a0   :  { %v1772_v34 = vmul.f32 -1.442695, %v1560_v31 }
0x28a2   :  { %2098 = vpow2.f32 %v1772_v34 }
0x28ac   :  { %v2099_v35 = vpop.eup %2098 }
0x28ad   :  { %v1564_v36 = vadd.f32 1.0, %v2099_v35 }
0x28af   :  { %2100 = vrcp.f32 %v1564_v36 }
0x28b9   :  { %v2101_v39 = vpop.eup %2100 }
0x28ba   :  { %v1567_v37 = vmul.f32 2.0, %v2101_v39  ;;  %v1569_v1 = vmul.f32 %v2101_v39, %v1483_v14 }
0x28bc   :  { %v1773_v28 = vadd.f32 -1.0, %v1567_v37 }
0x28be   :  { %1571 = vrot.lane.b32.xlu1 %v1773_v28, %s2114_s3 }
0x2930   :  { %v1572_v18 = vpop.permute.xlu1 %1571 }
0x2931   :  { %v1574_v38 = vmul.f32 %v2101_v39, %v1572_v18 }
0x2933   :  { %1576 = vrot.lane.b32.xlu0 %v1574_v38, %s2115_s9 }
0x29a5   :  { %v1577_v40 = vpop.permute.xlu0 %1576 }
0x29a6   :  { %v1579_v41 = vadd.f32 %v1577_v40, %v1569_v1 }
0x29a8   :  { %2102 = vtanh.f32 %v1579_v41 }
0x29b2   :  { %v2103_v44 = vpop.eup %2102 }
0x29b3   :  { %1582 = vrot.lane.b32.xlu1 %v2103_v44, %s2114_s3 }
0x2a25   :  { %v1583_v45 = vpop.permute.xlu1 %1582 }
0x2a26   :  { %v1585_v46 = vmul.f32 %v2101_v39, %v1583_v45 }
0x2a28   :  { %v1592_v47 = vpack.c.bf16 %v1585_v46, %v1585_v46 }
0x2a2a   :  { %1598 = vrot.lane.b32.xlu0 %v1592_v47, %s2115_s9 }
0x2a9c   :  { %v1599_v48 = vpop.permute.xlu0 %1598 }
0x2a9d   :  { %1971 = vmatmul.mubr.msk.bf16.vlgmr.msra.gmra.mrb[32].mxu1 %vm108_vm6, %v1599_v48 }
0x2b70   :  { %v1649_v50 = vpop.f32.mrb[32].mxu1 }
0x2b71   :  { %v1655_v6 = vadd.f32 %v1649_v50, %v1591_v49  ;;  %v1972_v51 = vpop.f32.mrb[33].mxu1 }
0x2b72   :  { %v1652_v52 = vpop.f32.mrb[34].mxu1 }
0x2b73   :  { %v1656_v55 = vmul.f32 %v1655_v6, %v2185_v20  ;;  %v1973_v0 = vpop.f32.mrb[35].mxu1 }
0x2b75   :  { %v1777_v56 = vmul.f32 -1.442695, %v1656_v55 }
0x2b77   :  { %2104 = vpow2.f32 %v1777_v56 }
0x2b81   :  { %v2105_v57 = vpop.eup %2104 }
0x2b82   :  { %v1660_v58 = vadd.f32 1.0, %v2105_v57 }
0x2b84   :  { %2106 = vrcp.f32 %v1660_v58 }
0x2b8e   :  { %v2107_v59 = vpop.eup %2106 }
0x2b8f   :  { %v1663_v60 = vmul.f32 2.0, %v2107_v59  ;;  %v1665_v20 = vmul.f32 %v2107_v59, %v1579_v41 }
0x2b91   :  { %v1778_v61 = vadd.f32 -1.0, %v1663_v60 }
0x2b93   :  { %1667 = vrot.lane.b32.xlu1 %v1778_v61, %s2114_s3 }
0x2c05   :  { %v1668_v62 = vpop.permute.xlu1 %1667 }
0x2c06   :  { %v1670_v63 = vmul.f32 %v2107_v59, %v1668_v62 }
0x2c08   :  { %1672 = vrot.lane.b32.xlu0 %v1670_v63, %s2115_s9 }
0x2c0c   :  { %1011 = vrot.lane.b32.xlu0 %v2386_v15, %s2115_s9 }
0x2c10   :  { %1203 = vrot.lane.b32.xlu0 %v2426_v2, %s2115_s9 }
0x2c14   :  { %1395 = vrot.lane.b32.xlu0 %v2466_v53, %s2115_s9 }
0x2c18   :  { %1587 = vrot.lane.b32.xlu0 %v1585_v46, %s2115_s9 }
0x2c7a   :  { %v1673_v3 = vpop.permute.xlu0 %1672 }
0x2c7b   :  { %v1675_v4 = vadd.f32 %v1673_v3, %v1665_v20 }
0x2c7d   :  { %2108 = vtanh.f32 %v1675_v4 }
0x2c7e   :  { %v1012_v5 = vpop.permute.xlu0 %1011 }
0x2c7f   :  { %1014 = vst.msk [vmem:[#allocation2] sm:$0x1] %vm183_vm7, %v1012_v5 }
0x2c82   :  { %v1204_v7 = vpop.permute.xlu0 %1203 }
0x2c83   :  { %1206 = vst.msk [vmem:[#allocation2 + $0x2] sm:$0x1] %vm183_vm7, %v1204_v7 }
0x2c86   :  { %v1396_v8 = vpop.permute.xlu0 %1395 }
0x2c87   :  { %v2109_v15 = vpop.eup %2108  ;;  %1398 = vst.msk [vmem:[#allocation2 + $0x4] sm:$0x1] %vm183_vm7, %v1396_v8 }
0x2c88   :  { %1678 = vrot.lane.b32.xlu1 %v2109_v15, %s2114_s3 }
0x2c8a   :  { %v1588_v2 = vpop.permute.xlu0 %1587 }
0x2c8b   :  { %1590 = vst.msk [vmem:[#allocation2 + $0x6] sm:$0x1] %vm183_vm7, %v1588_v2 }
0x2c8c   :  { %1107 = vrot.lane.b32.xlu1 %v2406_v54, %s2115_s9 }
0x2c90   :  { %1299 = vrot.lane.b32.xlu1 %v2446_v32, %s2115_s9 }
0x2c94   :  { %1491 = vrot.lane.b32.xlu1 %v2485_v22, %s2115_s9 }
0x2cfa   :  { %v1679_v53 = vpop.permute.xlu1 %1678 }
0x2cfb   :  { %v1681_v9 = vmul.f32 %v2107_v59, %v1679_v53 }
0x2cfd   :  { %1683 = vrot.lane.b32.xlu1 %v1681_v9, %s2115_s9 }
0x2cfe   :  { %v1108_v10 = vpop.permute.xlu1 %1107 }
0x2cff   :  { %1110 = vst.msk [vmem:[#allocation2 + $0x1] sm:$0x1] %vm183_vm7, %v1108_v10 }
0x2d02   :  { %v1300_v11 = vpop.permute.xlu1 %1299 }
0x2d03   :  { %1302 = vst.msk [vmem:[#allocation2 + $0x3] sm:$0x1] %vm183_vm7, %v1300_v11 }
0x2d06   :  { %v1492_v12 = vpop.permute.xlu1 %1491 }
0x2d07   :  { %1494 = vst.msk [vmem:[#allocation2 + $0x5] sm:$0x1] %vm183_vm7, %v1492_v12 }
0x2d6f   :  { %v1684_v54 = vpop.permute.xlu1 %1683 }
0x2d70   :  { %1686 = vst.msk [vmem:[#allocation2 + $0x7] sm:$0x1] %vm183_vm7, %v1684_v54 }
0x2d77   :  { %v1687_v32 = vld [vmem:[#allocation2] sm:$0xff] }
0x2d78   :  { %v1688_v13 = vpack.c.bf16 %v1687_v32, %v1687_v32 }
0x2d7a   :  { %1690 = vst.msk [vmem:[%s2540_s7] sm:$0xf] %vm1689_vm8, %v1688_v13 }

</bundles_post_ra>
